<compile_context>
chip_gen: v7x
topology: tpu7x:2x2x1
jax: 0.10.0
libtpu: 0.0.40
codegen_flags: <defaults>
</compile_context>

<pallas_src>
import jax
import jax.numpy as jnp
from jax.experimental import pallas as pl
from jax.experimental.pallas import tpu as pltpu


def _round_up(x, m):
    return ((x + m - 1) // m) * m


def _mlp_kernel(x_ref,
                w1_ref, b1_ref,
                w2_ref, b2_ref,
                w3_ref, b3_ref,
                w4_ref, b4_ref,
                w5_ref, b5_ref,
                o_ref):
    """One batch tile through all 5 layers. Weights are VMEM-resident bf16; acc in f32."""
    h = x_ref[...]  # (TILE_B, D0_pad) bf16

    def linear_relu(h, w_ref, b_ref):
        z = jnp.dot(h, w_ref[...], preferred_element_type=jnp.float32) + b_ref[...]
        return jnp.maximum(z, 0.0).astype(jnp.bfloat16)

    h = linear_relu(h, w1_ref, b1_ref)   # Linear + ReLU (+ Dropout = id in eval)
    h = linear_relu(h, w2_ref, b2_ref)
    h = linear_relu(h, w3_ref, b3_ref)
    h = linear_relu(h, w4_ref, b4_ref)

    # Final Linear + Sigmoid (exp and approx-reciprocal both run on the EUP slot).
    z = jnp.dot(h, w5_ref[...], preferred_element_type=jnp.float32) + b5_ref[...]
    o_ref[...] = pl.reciprocal(1.0 + jnp.exp(-z), approx=True)


def mlp_forward(x, params, *, tile_b=256):
    """x: (B, input_dim) f32.  params: list of (W_(in,out) f32, b_(1,out) f32) pairs."""
    B, input_dim = x.shape
    dims = [input_dim] + [w.shape[1] for w, _ in params]
    n_out = dims[-1]

    # Lane-pad every feature dim to a multiple of 128.
    dims_p = [_round_up(d, 128) for d in dims]

    # Batch tiling: tile_b a multiple of 8; pad B up to a multiple of tile_b.
    tile_b = max(8, min(tile_b, _round_up(B, 8)))
    b_pad = _round_up(B, tile_b)
    n_blocks = b_pad // tile_b

    # Zero-pad + cast. Padded x columns are zero and padded weight rows/cols & bias cols
    # are zero, so the padded lanes carry exact zeros through every ReLU layer.
    x_p = (jnp.zeros((b_pad, dims_p[0]), jnp.bfloat16)
           .at[:B, :input_dim].set(x.astype(jnp.bfloat16)))
    flat = []
    for li, (w, b) in enumerate(params):
        din, dout = w.shape
        w_p = (jnp.zeros((dims_p[li], dims_p[li + 1]), jnp.bfloat16)
               .at[:din, :dout].set(w.astype(jnp.bfloat16)))
        b_p = (jnp.zeros((1, dims_p[li + 1]), jnp.float32)
               .at[:, :dout].set(b.astype(jnp.float32)))
        flat.extend([w_p, b_p])

    x_spec = pl.BlockSpec((tile_b, dims_p[0]), lambda i: (i, 0))
    out_spec = pl.BlockSpec((tile_b, dims_p[-1]), lambda i: (i, 0))

    def resident(arr):  # full array as one block, same block index every grid step
        return pl.BlockSpec(arr.shape, lambda i: (0,) * arr.ndim)

    w_specs = [resident(a) for a in flat]

    # Advisory cost estimate for XLA scheduling (padded problem size).
    flops = 2 * b_pad * sum(dims_p[i] * dims_p[i + 1] for i in range(len(dims_p) - 1))
    bytes_accessed = (x_p.size * x_p.dtype.itemsize
                      + sum(a.size * a.dtype.itemsize for a in flat)
                      + b_pad * dims_p[-1] * 4)
    cost = pl.CostEstimate(flops=flops,
                           transcendentals=b_pad * dims_p[-1],
                           bytes_accessed=bytes_accessed)

    # VMEM budget from actual footprints: resident weights/biases (x2 pipeline buffers),
    # double-buffered x/out tiles, intermediate activations, plus headroom. Never request
    # the entire physical VMEM (v7x only has 64 MiB per TensorCore).
    weight_bytes = sum(a.size * a.dtype.itemsize for a in flat)
    act_bytes = 2 * tile_b * dims_p[0] * 2 + 2 * tile_b * dims_p[-1] * 4
    inter_bytes = 4 * tile_b * max(dims_p) * 4
    vmem_bytes = max(16 << 20,
                     min(2 * weight_bytes + act_bytes + inter_bytes + (8 << 20), 48 << 20))

    out_p = pl.pallas_call(
        _mlp_kernel,
        out_shape=jax.ShapeDtypeStruct((b_pad, dims_p[-1]), jnp.float32),
        grid_spec=pltpu.PrefetchScalarGridSpec(
            num_scalar_prefetch=0,
            grid=(n_blocks,),
            in_specs=[x_spec] + w_specs,
            out_specs=out_spec,
        ),
        compiler_params=pltpu.CompilerParams(
            dimension_semantics=("parallel",),
            vmem_limit_bytes=vmem_bytes,
        ),
        cost_estimate=cost,
    )(x_p, *flat)

    return out_p[:B, :n_out]


def init_params(key, dims):
    """Kaiming-normal (relu) weights, zero biases — matches the PyTorch init."""
    params = []
    for i in range(len(dims) - 1):
        fan_in, fan_out = dims[i], dims[i + 1]
        key, sub = jax.random.split(key)
        std = (2.0 / fan_in) ** 0.5
        w = std * jax.random.normal(sub, (fan_in, fan_out), dtype=jnp.float32)
        b = jnp.zeros((1, fan_out), dtype=jnp.float32)
        params.append((w, b))
    return params


def reference_forward(x, params):
    """Pure-JAX f32 reference of the PyTorch forward (eval mode)."""
    h = x.astype(jnp.float32)
    for i, (w, b) in enumerate(params):
        z = h @ w + b
        h = jnp.maximum(z, 0.0) if i < len(params) - 1 else jax.nn.sigmoid(z)
    return h


if __name__ == "__main__":
    # Small stand-ins for the module's globals (input_dim, n_hidden1..4, n_output).
    # Deliberately NOT multiples of 128/8 to exercise the in-wrapper lane/batch padding.
    input_dim = 300
    n_hidden1, n_hidden2, n_hidden3, n_hidden4, n_output = 200, 160, 96, 72, 37
    batch = 200  # not a multiple of the 128-row batch tile -> grid of 2 with row padding

    key = jax.random.PRNGKey(0)
    key, kx = jax.random.split(key)
    x = jax.random.normal(kx, (batch, input_dim), dtype=jnp.float32)

    params = init_params(
        key, [input_dim, n_hidden1, n_hidden2, n_hidden3, n_hidden4, n_output])

    # TODO(synk): Dropout(p=0.5) is a no-op in eval mode; training-mode stochastic masking
    # (pltpu.prng_seed / pltpu.prng_random_bits) is not implemented here.

    out = mlp_forward(x, params, tile_b=128)
    out = jax.block_until_ready(out)

    ref = reference_forward(x, params)
    assert out.shape == (batch, n_output), f"bad shape {out.shape}"
    # Kernel runs bf16 weights/activations with f32 accumulation; sigmoid output in [0,1],
    # so a ~1e-2 absolute tolerance vs. the f32 reference is comfortable.
    max_err = float(jnp.max(jnp.abs(out - ref)))
    assert max_err < 2e-2, f"mismatch vs JAX reference, max_err={max_err}"

    print("KERNEL_OK")
</pallas_src>

<mosaic_0001>
module attributes {stable_mosaic.version = 11 : i64} {
  func.func @_mlp_kernel(%arg0: i32, %arg1: memref<128x384xbf16, #tpu.memory_space<vmem>>, %arg2: memref<384x256xbf16, #tpu.memory_space<vmem>>, %arg3: memref<1x256xf32, #tpu.memory_space<vmem>>, %arg4: memref<256x256xbf16, #tpu.memory_space<vmem>>, %arg5: memref<1x256xf32, #tpu.memory_space<vmem>>, %arg6: memref<256x128xbf16, #tpu.memory_space<vmem>>, %arg7: memref<1x128xf32, #tpu.memory_space<vmem>>, %arg8: memref<128x128xbf16, #tpu.memory_space<vmem>>, %arg9: memref<1x128xf32, #tpu.memory_space<vmem>>, %arg10: memref<128x128xbf16, #tpu.memory_space<vmem>>, %arg11: memref<1x128xf32, #tpu.memory_space<vmem>>, %arg12: memref<128x128xf32, #tpu.memory_space<vmem>>) attributes {dimension_semantics = [#tpu.dimension_semantics<parallel>], iteration_bounds = array<i64: 2>, scalar_prefetch = 0 : i64, scratch_operands = 0 : i64, tpu.core_type = #tpu.core_type<tc>, window_params = [{transform_indices = @transform_0, window_bounds = array<i64: 128, 384>}, {pipeline_mode = #tpu.pipeline_mode<synchronous>, transform_indices = @transform_1, window_bounds = array<i64: 384, 256>}, {pipeline_mode = #tpu.pipeline_mode<synchronous>, transform_indices = @transform_2, window_bounds = array<i64: 1, 256>}, {pipeline_mode = #tpu.pipeline_mode<synchronous>, transform_indices = @transform_3, window_bounds = array<i64: 256, 256>}, {pipeline_mode = #tpu.pipeline_mode<synchronous>, transform_indices = @transform_4, window_bounds = array<i64: 1, 256>}, {pipeline_mode = #tpu.pipeline_mode<synchronous>, transform_indices = @transform_5, window_bounds = array<i64: 256, 128>}, {pipeline_mode = #tpu.pipeline_mode<synchronous>, transform_indices = @transform_6, window_bounds = array<i64: 1, 128>}, {pipeline_mode = #tpu.pipeline_mode<synchronous>, transform_indices = @transform_7, window_bounds = array<i64: 128, 128>}, {pipeline_mode = #tpu.pipeline_mode<synchronous>, transform_indices = @transform_8, window_bounds = array<i64: 1, 128>}, {pipeline_mode = #tpu.pipeline_mode<synchronous>, transform_indices = @transform_9, window_bounds = array<i64: 128, 128>}, {pipeline_mode = #tpu.pipeline_mode<synchronous>, transform_indices = @transform_10, window_bounds = array<i64: 1, 128>}, {transform_indices = @transform_11, window_bounds = array<i64: 128, 128>}]} {
    %c0 = arith.constant 0 : index
    %c0_0 = arith.constant 0 : index
    %0 = vector.load %arg1[%c0, %c0_0] : memref<128x384xbf16, #tpu.memory_space<vmem>>, vector<128x384xbf16>
    %c0_1 = arith.constant 0 : index
    %c0_2 = arith.constant 0 : index
    %1 = vector.load %arg2[%c0_1, %c0_2] : memref<384x256xbf16, #tpu.memory_space<vmem>>, vector<384x256xbf16>
    %cst = arith.constant dense<0.000000e+00> : vector<128x256xf32>
    %2 = tpu.matmul %0, %1, %cst {dimension_numbers = #tpu.dot_dimension_numbers<[1], [0], [0], [1], [0, 0, 1, 1], [], []>} : vector<128x384xbf16>, vector<384x256xbf16>, vector<128x256xf32> -> vector<128x256xf32>
    %c0_3 = arith.constant 0 : index
    %c0_4 = arith.constant 0 : index
    %3 = vector.load %arg3[%c0_3, %c0_4] : memref<1x256xf32, #tpu.memory_space<vmem>>, vector<1x256xf32>
    %4 = vector.broadcast %3 : vector<1x256xf32> to vector<128x256xf32>
    %5 = arith.addf %2, %4 : vector<128x256xf32>
    %cst_5 = arith.constant 0.000000e+00 : f32
    %6 = vector.broadcast %cst_5 : f32 to vector<128x256xf32>
    %7 = arith.maximumf %5, %6 : vector<128x256xf32>
    %8 = arith.truncf %7 : vector<128x256xf32> to vector<128x256xbf16>
    %c0_6 = arith.constant 0 : index
    %c0_7 = arith.constant 0 : index
    %9 = vector.load %arg4[%c0_6, %c0_7] : memref<256x256xbf16, #tpu.memory_space<vmem>>, vector<256x256xbf16>
    %cst_8 = arith.constant dense<0.000000e+00> : vector<128x256xf32>
    %10 = tpu.matmul %8, %9, %cst_8 {dimension_numbers = #tpu.dot_dimension_numbers<[1], [0], [0], [1], [0, 0, 1, 1], [], []>} : vector<128x256xbf16>, vector<256x256xbf16>, vector<128x256xf32> -> vector<128x256xf32>
    %c0_9 = arith.constant 0 : index
    %c0_10 = arith.constant 0 : index
    %11 = vector.load %arg5[%c0_9, %c0_10] : memref<1x256xf32, #tpu.memory_space<vmem>>, vector<1x256xf32>
    %12 = vector.broadcast %11 : vector<1x256xf32> to vector<128x256xf32>
    %13 = arith.addf %10, %12 : vector<128x256xf32>
    %cst_11 = arith.constant 0.000000e+00 : f32
    %14 = vector.broadcast %cst_11 : f32 to vector<128x256xf32>
    %15 = arith.maximumf %13, %14 : vector<128x256xf32>
    %16 = arith.truncf %15 : vector<128x256xf32> to vector<128x256xbf16>
    %c0_12 = arith.constant 0 : index
    %c0_13 = arith.constant 0 : index
    %17 = vector.load %arg6[%c0_12, %c0_13] : memref<256x128xbf16, #tpu.memory_space<vmem>>, vector<256x128xbf16>
    %cst_14 = arith.constant dense<0.000000e+00> : vector<128x128xf32>
    %18 = tpu.matmul %16, %17, %cst_14 {dimension_numbers = #tpu.dot_dimension_numbers<[1], [0], [0], [1], [0, 0, 1, 1], [], []>} : vector<128x256xbf16>, vector<256x128xbf16>, vector<128x128xf32> -> vector<128x128xf32>
    %c0_15 = arith.constant 0 : index
    %c0_16 = arith.constant 0 : index
    %19 = vector.load %arg7[%c0_15, %c0_16] : memref<1x128xf32, #tpu.memory_space<vmem>>, vector<1x128xf32>
    %20 = vector.broadcast %19 : vector<1x128xf32> to vector<128x128xf32>
    %21 = arith.addf %18, %20 : vector<128x128xf32>
    %cst_17 = arith.constant 0.000000e+00 : f32
    %22 = vector.broadcast %cst_17 : f32 to vector<128x128xf32>
    %23 = arith.maximumf %21, %22 : vector<128x128xf32>
    %24 = arith.truncf %23 : vector<128x128xf32> to vector<128x128xbf16>
    %c0_18 = arith.constant 0 : index
    %c0_19 = arith.constant 0 : index
    %25 = vector.load %arg8[%c0_18, %c0_19] : memref<128x128xbf16, #tpu.memory_space<vmem>>, vector<128x128xbf16>
    %cst_20 = arith.constant dense<0.000000e+00> : vector<128x128xf32>
    %26 = tpu.matmul %24, %25, %cst_20 {dimension_numbers = #tpu.dot_dimension_numbers<[1], [0], [0], [1], [0, 0, 1, 1], [], []>} : vector<128x128xbf16>, vector<128x128xbf16>, vector<128x128xf32> -> vector<128x128xf32>
    %c0_21 = arith.constant 0 : index
    %c0_22 = arith.constant 0 : index
    %27 = vector.load %arg9[%c0_21, %c0_22] : memref<1x128xf32, #tpu.memory_space<vmem>>, vector<1x128xf32>
    %28 = vector.broadcast %27 : vector<1x128xf32> to vector<128x128xf32>
    %29 = arith.addf %26, %28 : vector<128x128xf32>
    %cst_23 = arith.constant 0.000000e+00 : f32
    %30 = vector.broadcast %cst_23 : f32 to vector<128x128xf32>
    %31 = arith.maximumf %29, %30 : vector<128x128xf32>
    %32 = arith.truncf %31 : vector<128x128xf32> to vector<128x128xbf16>
    %c0_24 = arith.constant 0 : index
    %c0_25 = arith.constant 0 : index
    %33 = vector.load %arg10[%c0_24, %c0_25] : memref<128x128xbf16, #tpu.memory_space<vmem>>, vector<128x128xbf16>
    %cst_26 = arith.constant dense<0.000000e+00> : vector<128x128xf32>
    %34 = tpu.matmul %32, %33, %cst_26 {dimension_numbers = #tpu.dot_dimension_numbers<[1], [0], [0], [1], [0, 0, 1, 1], [], []>} : vector<128x128xbf16>, vector<128x128xbf16>, vector<128x128xf32> -> vector<128x128xf32>
    %c0_27 = arith.constant 0 : index
    %c0_28 = arith.constant 0 : index
    %35 = vector.load %arg11[%c0_27, %c0_28] : memref<1x128xf32, #tpu.memory_space<vmem>>, vector<1x128xf32>
    %36 = vector.broadcast %35 : vector<1x128xf32> to vector<128x128xf32>
    %37 = arith.addf %34, %36 : vector<128x128xf32>
    %cst_29 = arith.constant 0.000000e+00 : f32
    %38 = vector.broadcast %cst_29 : f32 to vector<128x128xf32>
    %39 = arith.subf %38, %37 : vector<128x128xf32>
    %40 = math.exp %39 : vector<128x128xf32>
    %cst_30 = arith.constant 1.000000e+00 : f32
    %41 = vector.broadcast %cst_30 : f32 to vector<128x128xf32>
    %42 = arith.addf %41, %40 : vector<128x128xf32>
    %43 = tpu.reciprocal %42 {approx = true} : vector<128x128xf32> -> vector<128x128xf32>
    %c0_31 = arith.constant 0 : index
    %c0_32 = arith.constant 0 : index
    %44 = vector.load %arg12[%c0_31, %c0_32] : memref<128x128xf32, #tpu.memory_space<vmem>>, vector<128x128xf32>
    tpu.vector_store %arg12[%c0_31, %c0_32], %43 {strides = array<i32>} : memref<128x128xf32, #tpu.memory_space<vmem>>, vector<128x128xf32>,
    return
  }
  func.func @transform_0(%arg0: i32) -> (i32, i32) {
    %c0_i32 = arith.constant 0 : i32
    %c0_i32_0 = arith.constant 0 : i32
    return %arg0, %c0_i32 : i32, i32
  }
  func.func @transform_1(%arg0: i32) -> (i32, i32) {
    %c0_i32 = arith.constant 0 : i32
    %c0_i32_0 = arith.constant 0 : i32
    %c0_i32_1 = arith.constant 0 : i32
    return %c0_i32, %c0_i32_0 : i32, i32
  }
  func.func @transform_2(%arg0: i32) -> (i32, i32) {
    %c0_i32 = arith.constant 0 : i32
    %c0_i32_0 = arith.constant 0 : i32
    %c0_i32_1 = arith.constant 0 : i32
    return %c0_i32, %c0_i32_0 : i32, i32
  }
  func.func @transform_3(%arg0: i32) -> (i32, i32) {
    %c0_i32 = arith.constant 0 : i32
    %c0_i32_0 = arith.constant 0 : i32
    %c0_i32_1 = arith.constant 0 : i32
    return %c0_i32, %c0_i32_0 : i32, i32
  }
  func.func @transform_4(%arg0: i32) -> (i32, i32) {
    %c0_i32 = arith.constant 0 : i32
    %c0_i32_0 = arith.constant 0 : i32
    %c0_i32_1 = arith.constant 0 : i32
    return %c0_i32, %c0_i32_0 : i32, i32
  }
  func.func @transform_5(%arg0: i32) -> (i32, i32) {
    %c0_i32 = arith.constant 0 : i32
    %c0_i32_0 = arith.constant 0 : i32
    %c0_i32_1 = arith.constant 0 : i32
    return %c0_i32, %c0_i32_0 : i32, i32
  }
  func.func @transform_6(%arg0: i32) -> (i32, i32) {
    %c0_i32 = arith.constant 0 : i32
    %c0_i32_0 = arith.constant 0 : i32
    %c0_i32_1 = arith.constant 0 : i32
    return %c0_i32, %c0_i32_0 : i32, i32
  }
  func.func @transform_7(%arg0: i32) -> (i32, i32) {
    %c0_i32 = arith.constant 0 : i32
    %c0_i32_0 = arith.constant 0 : i32
    %c0_i32_1 = arith.constant 0 : i32
    return %c0_i32, %c0_i32_0 : i32, i32
  }
  func.func @transform_8(%arg0: i32) -> (i32, i32) {
    %c0_i32 = arith.constant 0 : i32
    %c0_i32_0 = arith.constant 0 : i32
    %c0_i32_1 = arith.constant 0 : i32
    return %c0_i32, %c0_i32_0 : i32, i32
  }
  func.func @transform_9(%arg0: i32) -> (i32, i32) {
    %c0_i32 = arith.constant 0 : i32
    %c0_i32_0 = arith.constant 0 : i32
    %c0_i32_1 = arith.constant 0 : i32
    return %c0_i32, %c0_i32_0 : i32, i32
  }
  func.func @transform_10(%arg0: i32) -> (i32, i32) {
    %c0_i32 = arith.constant 0 : i32
    %c0_i32_0 = arith.constant 0 : i32
    %c0_i32_1 = arith.constant 0 : i32
    return %c0_i32, %c0_i32_0 : i32, i32
  }
  func.func @transform_11(%arg0: i32) -> (i32, i32) {
    %c0_i32 = arith.constant 0 : i32
    %c0_i32_0 = arith.constant 0 : i32
    return %arg0, %c0_i32 : i32, i32
  }
}

</mosaic_0001>

<bundles_post_ra>
// kernel: tpu_custom_call.1
= control target key start
LH: loop header
LB: loop body
LE: loop exit
PB: predicated region body
PF: predicated region fallthrough
CT: control target
= control target key end

     0   :  { %s3991_s0 = inlined_call_operand.hbm [shape: bf16[256,384], index: 0, kind: input, shape index: {}]   ;;  %s3992_s1 = inlined_call_operand.hbm [shape: bf16[384,256], index: 1, kind: input, shape index: {}]   ;;  %s3993_s2 = inlined_call_operand.vmem [shape: f32[1,256], index: 2, kind: input, shape index: {}]   ;;  %s3994_s3 = inlined_call_operand.hbm [shape: bf16[256,256], index: 3, kind: input, shape index: {}]   ;;  %s3995_s4 = inlined_call_operand.vmem [shape: f32[1,256], index: 4, kind: input, shape index: {}]   ;;  %s3996_s5 = inlined_call_operand.hbm [shape: bf16[256,128], index: 5, kind: input, shape index: {}]   ;;  %s3997_s6 = inlined_call_operand.vmem [shape: f32[1,128], index: 6, kind: input, shape index: {}]   ;;  %s3998_s7 = inlined_call_operand.hbm [shape: bf16[128,128], index: 7, kind: input, shape index: {}]   ;;  %s3999_s8 = inlined_call_operand.vmem [shape: f32[1,128], index: 8, kind: input, shape index: {}]   ;;  %s4000_s9 = inlined_call_operand.hbm [shape: bf16[128,128], index: 9, kind: input, shape index: {}]   ;;  %s4001_s10 = inlined_call_operand.vmem [shape: f32[1,128], index: 10, kind: input, shape index: {}]   ;;  %s4002_s11 = inlined_call_operand.hbm [shape: f32[256,128], index: 11, kind: output, shape index: {}]  }
   0x1   :  { %4012 = sst [smem:[#allocation19_spill]] %s3992_s1 }
   0x2   :  { %4013 = sst [smem:[#allocation20_spill]] %s3994_s3 }
   0x3   :  { %4014 = sst [smem:[#allocation21_spill]] %s3999_s8 }
   0x4   :  { %4015 = sst [smem:[#allocation22_spill]] %s4001_s10 }
   0x5   :  { %4016 = sst [smem:[#allocation23_spill]] %s4002_s11 }
   0x6   :  { %16 = vsyncpa [#allocation3], 0 }
   0x7   :  { %18 = vsyncpa [#allocation3 + $0x1], 0 }
   0x8   :  { %19 = vsyncpa [#allocation6], 0 }
   0x9   :  { %20 = vsyncpa [#allocation9], 0 }
   0xa   :  { %21 = vsyncpa [#allocation12], 0 }
   0xb   :  { %22 = vsyncpa [#allocation4], 0 }
   0xc   :  { %24 = vsyncpa [#allocation4 + $0x1], 0  ;;  %s3498_s17 = smov 0   ;;  %s3500_s18 = smov 0  }
   0xd   :  { %s3502_s19 = smov 0   ;;  %s3504_s20 = smov 0  }
   0xe LB: > { %s3422_s21 = smov [#allocation5]   ;;  %s3519_s23 = sadd.s32 4294967295, %s3420_s20   ;;  %s3420_s20 = sphi %s3504_s20, %s4046_s20   ;;  %s3416_s19 = sphi %s3502_s19, %s4045_s19   ;;  %s3412_s18 = sphi %s3500_s18, %s4044_s18   ;;  %s3408_s17 = sphi %s3498_s17, %s4043_s17  }
   0xf   : > { %s309_s22 = sshll.u32 %s3422_s21, 4  ;;  %p2429_p0 = scmp.ge.s32.totalorder %s3420_s20, 1  ;;  %s3524_s22 = int_to_ptr.vmem [resolvable:$true] %s309_s22 }
  0x10   : > { %p4005_p1 = scmp.eq.s32.totalorder %s3519_s23, 0  ;;  %p297_p2 = scmp.lt.s32.totalorder %s3420_s20, 3 }
  0x11   : > { %s3423_s25 = smov [#allocation8]   ;;  %s3424_s28 = smov [#allocation7]  }
  0x12   : > { %p3526_p3 = pnand %p2429_p0, %p297_p2  ;;  %s341_s26 = sshll.u32 %s3423_s25, 4  ;;  %s3539_s26 = int_to_ptr.vmem [resolvable:$true] %s341_s26 }
  0x13   : > { %s3541_s29 = sshll.u32 %s3424_s28, 4  ;;  %s4019_s1 = sld [smem:[#allocation19_spill]]  ;;  %s326_s29 = int_to_ptr.vmem [resolvable:$true] %s3541_s29 }
  0x14   : > { %s4017_s24 = scalar_select %p3526_p3, 1, 0 }
  0x15   : > { %p2842_p5 = pneg %p3526_p3 }
  0x17   : > { %p3535_p6 = pnand %p2842_p5, %p4005_p1 }
  0x19   : > { %s3172_s13 = scalar_lea.hbm %s4019_s1, 6144  ;;  %p3551_p8 = pneg %p3535_p6 }
  0x1a   : > { %p3173_p7 = scmp.ne.s32.totalorder %s4019_s1, %s3172_s13  ;;  %p3179_p11 = scmp.lt.u32.totalorder %s3172_s13, %s4019_s1 }
  0x1c   : > { %p3175_p9 = pnand %p3551_p8, %p3173_p7 }
  0x1e   : > { %p3176_p10 = pneg %p3175_p9 }
  0x20   : > { %p3181_p12 = pnand %p3179_p11, %p3176_p10 }
  0x22   : > { %3184 = shalt.err (!%p3181_p12)
}
  0x23   : > { %s3185_s28 = scalar_lea.vmem %s3524_s22, 6144  ;;  %p3193_p5 = scmp.lt.s32.totalorder %s3524_s22, %s3524_s22 }
  0x24   : > { %p3186_p13 = scmp.ne.s32.totalorder %s3524_s22, %s3185_s28  ;;  %p3194_p4 = scmp.lt.s32.totalorder %s3185_s28, %s3185_s28 }
  0x26   : > { %p3188_p0 = pnand %p3186_p13, %p3551_p8  ;;  %p3195_p7 = por %p3194_p4, %p3193_p5 }
  0x28   : > { %p3189_p2 = pneg %p3188_p0 }
  0x2a   : > { %p3196_p9 = pnand %p3195_p7, %p3189_p2 }
  0x2c   : > { %3199 = shalt.err (!%p3196_p9)
}
  0x2d   : > { %s4004_s30 = smov 128   ;;  %s3426_s12 = smov 8  }
  0x2e   : > { %2845 = dma.hbm_to_vmem [thread:$0]  (!%p3535_p6), %s4019_s1, 6144, %s3524_s22, [#allocation6], %s4004_s30, %s4004_s30, %s3426_s12  }
  0x2f   : > { %s3200_s25 = scalar_lea.hbm %s3996_s5, 2048 }
  0x30   : > { %p3201_p4 = scmp.ne.s32.totalorder %s3996_s5, %s3200_s25  ;;  %p3207_p12 = scmp.lt.u32.totalorder %s3200_s25, %s3996_s5 }
  0x32   : > { %p3203_p10 = pnand %p3201_p4, %p3551_p8 }
  0x34   : > { %p3204_p11 = pneg %p3203_p10 }
  0x36   : > { %p3209_p13 = pnand %p3207_p12, %p3204_p11 }
  0x38   : > { %3212 = shalt.err (!%p3209_p13)
}
  0x39   : > { %s3213_s22 = scalar_lea.vmem %s3539_s26, 2048  ;;  %p3221_p7 = scmp.lt.s32.totalorder %s3539_s26, %s3539_s26 }
  0x3a   : > { %p3214_p0 = scmp.ne.s32.totalorder %s3539_s26, %s3213_s22  ;;  %p3222_p9 = scmp.lt.s32.totalorder %s3213_s22, %s3213_s22 }
  0x3c   : > { %p3216_p2 = pnand %p3214_p0, %p3551_p8  ;;  %p3223_p4 = por %p3222_p9, %p3221_p7 }
  0x3e   : > { %p3217_p5 = pneg %p3216_p2 }
  0x40   : > { %p3224_p10 = pnand %p3223_p4, %p3217_p5 }
  0x42   : > { %3227 = shalt.err (!%p3224_p10)
}
  0x43   : > { %s4007_s11 = smov 64   ;;  %s4009_s8 = smov 4  }
  0x44   : > { %2851 = dma.hbm_to_vmem [thread:$0]  (!%p3535_p6), %s3996_s5, 2048, %s3539_s26, [#allocation9], %s4007_s11, %s4007_s11, %s4009_s8  }
  0x45   : > { %s4021_s3 = sld [smem:[#allocation20_spill]] }
  0x4b   : > { %s3228_s21 = scalar_lea.hbm %s4021_s3, 4096 }
  0x4c   : > { %p3229_p11 = scmp.ne.s32.totalorder %s4021_s3, %s3228_s21  ;;  %p3235_p0 = scmp.lt.u32.totalorder %s3228_s21, %s4021_s3 }
  0x4e   : > { %p3231_p12 = pnand %p3229_p11, %p3551_p8 }
  0x50   : > { %p3232_p13 = pneg %p3231_p12 }
  0x52   : > { %p3237_p2 = pnand %p3235_p0, %p3232_p13 }
  0x54   : > { %3240 = shalt.err (!%p3237_p2)
}
  0x55   : > { %s3241_s10 = scalar_lea.vmem %s326_s29, 4096  ;;  %p3249_p4 = scmp.lt.s32.totalorder %s326_s29, %s326_s29 }
  0x56   : > { %p3242_p5 = scmp.ne.s32.totalorder %s326_s29, %s3241_s10  ;;  %p3250_p10 = scmp.lt.s32.totalorder %s3241_s10, %s3241_s10 }
  0x58   : > { %p3244_p7 = pnand %p3242_p5, %p3551_p8  ;;  %p3251_p1 = por %p3250_p10, %p3249_p4 }
  0x5a   : > { %p3245_p9 = pneg %p3244_p7 }
  0x5c   : > { %p3252_p3 = pnand %p3251_p1, %p3245_p9 }
  0x5e   : > { %3255 = shalt.err (!%p3252_p3)
}
  0x5f   : > { %s4022_s26 = smov 128   ;;  %s3429_s14 = smov [#allocation10]  }
  0x60   : > { %2848 = dma.hbm_to_vmem [thread:$0]  (!%p3535_p6), %s4021_s3, 4096, %s326_s29, [#allocation6], %s4022_s26, %s4022_s26, %s3426_s12  }
  0x61   : > { %s357_s15 = sshll.u32 %s3429_s14, 4  ;;  %s3430_s21 = smov [#allocation11]   ;;  %s358_s15 = int_to_ptr.vmem [resolvable:$true] %s357_s15 }
  0x62   : > { %s373_s25 = sshll.u32 %s3430_s21, 4  ;;  %s3256_s10 = scalar_lea.hbm %s3998_s7, 1024  ;;  %s374_s25 = int_to_ptr.vmem [resolvable:$true] %s373_s25 }
  0x63   : > { %p3257_p1 = scmp.ne.s32.totalorder %s3998_s7, %s3256_s10  ;;  %p3263_p12 = scmp.lt.u32.totalorder %s3256_s10, %s3998_s7 }
  0x65   : > { %p3259_p3 = pnand %p3257_p1, %p3551_p8 }
  0x67   : > { %p3260_p11 = pneg %p3259_p3 }
  0x69   : > { %p3265_p13 = pnand %p3263_p12, %p3260_p11 }
  0x6b   : > { %3268 = shalt.err (!%p3265_p13)
}
  0x6c   : > { %s3269_s29 = scalar_lea.vmem %s358_s15, 1024  ;;  %p3277_p7 = scmp.lt.s32.totalorder %s358_s15, %s358_s15 }
  0x6d   : > { %p3270_p0 = scmp.ne.s32.totalorder %s358_s15, %s3269_s29  ;;  %p3278_p9 = scmp.lt.s32.totalorder %s3269_s29, %s3269_s29 }
  0x6f   : > { %p3272_p2 = pnand %p3270_p0, %p3551_p8  ;;  %p3279_p4 = por %p3278_p9, %p3277_p7 }
  0x71   : > { %p3273_p5 = pneg %p3272_p2 }
  0x73   : > { %p3280_p10 = pnand %p3279_p4, %p3273_p5 }
  0x75   : > { %3283 = shalt.err (!%p3280_p10)
}
  0x76   : > { %s4023_s12 = smov 4   ;;  %s4024_s11 = smov 64  }
  0x77   : > { %2854 = dma.hbm_to_vmem [thread:$0]  (!%p3535_p6), %s3998_s7, 1024, %s358_s15, [#allocation9], %s4024_s11, %s4024_s11, %s4023_s12  }
  0x78   : > { %s3284_s14 = scalar_lea.hbm %s4000_s9, 1024 }
  0x79   : > { %p3285_p1 = scmp.ne.s32.totalorder %s4000_s9, %s3284_s14  ;;  %p3291_p12 = scmp.lt.u32.totalorder %s3284_s14, %s4000_s9 }
  0x7b   : > { %p3287_p3 = pnand %p3285_p1, %p3551_p8 }
  0x7d   : > { %p3288_p11 = pneg %p3287_p3 }
  0x7f   : > { %p3293_p13 = pnand %p3291_p12, %p3288_p11 }
  0x81   : > { %3296 = shalt.err (!%p3293_p13)
}
  0x82   : > { %s3297_s30 = scalar_lea.vmem %s374_s25, 1024  ;;  %p3305_p7 = scmp.lt.s32.totalorder %s374_s25, %s374_s25 }
  0x83   : > { %p3298_p0 = scmp.ne.s32.totalorder %s374_s25, %s3297_s30  ;;  %p3306_p9 = scmp.lt.s32.totalorder %s3297_s30, %s3297_s30 }
  0x85   : > { %p3300_p2 = pnand %p3298_p0, %p3551_p8  ;;  %p3307_p4 = por %p3306_p9, %p3305_p7 }
  0x87   : > { %p3301_p5 = pneg %p3300_p2 }
  0x89   : > { %p3308_p10 = pnand %p3307_p4, %p3301_p5 }
  0x8b   : > { %3311 = shalt.err (!%p3308_p10)
}
  0x8c   : > { %2857 = dma.hbm_to_vmem [thread:$0]  (!%p3535_p6), %s4000_s9, 1024, %s374_s25, [#allocation12], %s4024_s11, %s4024_s11, %s4023_s12  }
  0x8d   : > { %s2428_s27 = sadd.s32 4294967294, %s3420_s20   ;;  %s3667_s16 = sadd.s32 1, %s3420_s20  }
  0x8e   : > { %s37_s1 = sadd.s32 1, %s3416_s19  ;;  %s34_s8 = ssub.s32 %s3420_s20, %s3667_s16 }
  0x8f   : > { %p44_p8 = scmp.ne.s32.totalorder %s3416_s19, %s3412_s18  ;;  %p35_p1 = scmp.eq.s32.totalorder %s34_s8, 0 }
  0x90   : > { %p45_p3 = scmp.eq.s32.totalorder %s3420_s20, 0  ;;  %p50_p11 = scmp.ne.s32.totalorder %s3412_s18, %s3408_s17 }
  0x91   : > { %p284_p12 = scmp.eq.s32.totalorder %s3519_s23, 1  ;;  %p4025_p0 = scmp.eq.s32.totalorder %s3519_s23, 0 }
  0x92   : > { %s3679_s26 = scalar_select %p35_p1, %s3416_s19, %s37_s1  }
  0x93   : > { %p46_p13 = por %p45_p3, %p44_p8  ;;  %p3683_p2 = por %p4025_p0, %p50_p11 }
  0x94   : > { %p3687_p6 = por %p284_p12, %p44_p8  ;;  %p290_p5 = scmp.eq.s32.totalorder %s2428_s27, 1 }
  0x95   : > { %p2871_p7 = scmp.lt.s32.totalorder %s3420_s20, 2  ;;  %s390_s12 = sand.u32 1, %s3416_s19  }
  0x96   : > { %s4027_s25 = scalar_select %p3687_p6, 1, 0 }
  0x97   : > { %p3693_p9 = por %p290_p5, %p50_p11  ;;  %s2815_s14 = smul.u32 192, %s390_s12 }
  0x98   : > { %p3697_p4 = pnand %p2871_p7, %p46_p13  ;;  %s2816_s28 = smul.u32 3072, %s3420_s20 }
  0x99   : > { %s4028_s11 = scalar_select %p3693_p9, 1, 0 }
  0x9a   : > { %s3705_s30 = scalar_lea.hbm %s3991_s0, %s2816_s28  ;;  %s394_s15 = scalar_lea.vmem [#allocation2], %s2815_s14 }
  0x9b   : > { %s402_s29 = sshll.u32 %s394_s15, 4  ;;  %s3709_s27 = scalar_lea.sflag [#allocation3], %s390_s12  ;;  %s3707_s29 = int_to_ptr.vmem [resolvable:$true] %s402_s29 }
  0x9c   : > { %s3312_s1 = scalar_lea.hbm %s3705_s30, 3072  ;;  %p3314_p8 = pneg %p3697_p4 }
  0x9d   : > { %p3313_p10 = scmp.ne.s32.totalorder %s3705_s30, %s3312_s1  ;;  %s3317_s22 = scalar_lea.hbm %s3991_s0, 6144 }
  0x9e   : > { %p3318_p11 = scmp.lt.u32.totalorder %s3705_s30, %s3991_s0  ;;  %p3319_p12 = scmp.lt.u32.totalorder %s3317_s22, %s3312_s1 }
  0x9f   : > { %p3315_p1 = pnand %p3314_p8, %p3313_p10  ;;  %p3321_p0 = scmp.lt.u32.totalorder %s3312_s1, %s3705_s30 }
  0xa0   : > { %p3320_p13 = por %p3319_p12, %p3318_p11 }
  0xa1   : > { %p3316_p3 = pneg %p3315_p1 }
  0xa2   : > { %p3322_p5 = por %p3321_p0, %p3320_p13 }
  0xa4   : > { %p3323_p7 = pnand %p3322_p5, %p3316_p3 }
  0xa6   : > { %3326 = shalt.err (!%p3323_p7)
}
  0xa7   : > { %s3327_s12 = scalar_lea.vmem %s3707_s29, 3072  ;;  %s3431_s14 = smov [#allocation2]  }
  0xa8   : > { %p3328_p10 = scmp.ne.s32.totalorder %s3707_s29, %s3327_s12  ;;  %s3332_s15 = sshll.u32 %s3431_s14, 4  ;;  %s3333_s15 = int_to_ptr.vmem [resolvable:$false] %s3332_s15 }
  0xa9   : > { %s3334_s3 = scalar_lea.vmem %s3333_s15, 6144  ;;  %p3335_p6 = scmp.lt.s32.totalorder %s3707_s29, %s3333_s15 }
  0xaa   : > { %p3330_p1 = pnand %p3328_p10, %p3314_p8  ;;  %p3336_p11 = scmp.lt.s32.totalorder %s3334_s3, %s3327_s12 }
  0xac   : > { %p3331_p9 = pneg %p3330_p1  ;;  %p3337_p12 = por %p3336_p11, %p3335_p6 }
  0xae   : > { %p3338_p13 = pnand %p3337_p12, %p3331_p9 }
  0xb0   : > { %3341 = shalt.err (!%p3338_p13)
}
  0xb1   : > { %s3432_s1 = smov 192   ;;  %s3433_s8 = smov 12  }
  0xb2   : > { %2861 = dma.hbm_to_vmem [thread:$0]  (!%p3697_p4), %s3705_s30, 3072, %s3707_s29, %s3709_s27, %s3432_s1, %s3432_s1, %s3433_s8  }
  0xb3   : > { %p4030_p8 = scmp.ne.s32.totalorder %s4017_s24, 0 }
  0xb4   : > { %s3740_s28 = sand.u32 (!%p4030_p8), 1, %s3412_s18  }
  0xb5   : > { %414 = sbr.rel (%p4030_p8) target bundleno = 1536 (0x600), region = 64  ;;  %s417_s10 = scalar_lea.sflag (!%p4030_p8), [#allocation3], %s3740_s28 }
  0xb6   : > { %s2817_s22 = smul.u32 (!%p4030_p8), 192, %s3740_s28 }
  0xb8   : > { %s3744_s12 = scalar_lea.vmem (!%p4030_p8), [#allocation2], %s2817_s22 }
  0xbc   : > { %3387 = dma.done.wait (%p3683_p2), %s417_s10, 3072  }
  0xbd   : > { %3389 = vsyncadd (%p3683_p2), %s417_s10, 4294964224  ;;  %p4031_p6 = scmp.eq.s32.totalorder %s3519_s23, 0 }
  0xbf   : > { %3391 = dma.done.wait (%p4031_p6), [#allocation6], 10240   ;;  %p4032_p9 = pmov %p4031_p6 }
  0xc0   : > { %p4033_p4 = pmov %p4031_p6 }
  0xc1   : > { %3393 = vsyncadd (%p4032_p9), [#allocation6], 4294957056 }
  0xc2   : > { %3395 = dma.done.wait (%p4033_p4), [#allocation9], 3072   ;;  %p4034_p3 = pmov %p4033_p4 }
  0xc4   : > { %3397 = vsyncadd (%p4034_p3), [#allocation9], 4294964224  ;;  %p4035_p0 = pmov %p4034_p3 }
  0xc6   : > { %3399 = dma.done.wait (%p4035_p0), [#allocation12], 1024   ;;  %p4036_p5 = pmov %p4035_p0 }
  0xc7   : > { %v2924_v0 = vld [vmem:[#allocation5 + $0x4] ss:$8 sps:$4 sm:$0xff]   ;;  %v2926_v1 = vld [vmem:[#allocation5] ss:$8 sps:$4 sm:$0xff]   ;;  %v2927_v2 = vld [vmem:[#allocation5 + $0x14] ss:$8 sps:$4 sm:$0xff]  }
  0xc8   : > { %3401 = vsyncadd (%p4036_p5), [#allocation12], 4294966272  ;;  %942 = vmatprep.subr.bf16.mxu0 %v2924_v0  ;;  %v2929_v3 = vld [vmem:[#allocation5 + $0x10] ss:$8 sps:$4 sm:$0xff]   ;;  %v2930_v4 = vld [vmem:[#allocation5 + $0x24] ss:$8 sps:$4 sm:$0xff]  }
  0xc9   : > { %943 = vmatpush1.bf16.msra.mxu0 %v2926_v1  ;;  %v2932_v5 = vld [vmem:[#allocation5 + $0x20] ss:$8 sps:$4 sm:$0xff]   ;;  %v2933_v6 = vld [vmem:[#allocation5 + $0x34] ss:$8 sps:$4 sm:$0xff]   ;;  %v2935_v7 = vld [vmem:[#allocation5 + $0x30] ss:$8 sps:$4 sm:$0xff]  }
  0xca   : > { %944 = vmatprep.subr.bf16.mxu0 %v2927_v2  ;;  %v2936_v8 = vld [vmem:[#allocation5 + $0x44] ss:$8 sps:$4 sm:$0xff]   ;;  %v2938_v9 = vld [vmem:[#allocation5 + $0x40] ss:$8 sps:$4 sm:$0xff]   ;;  %v2939_v10 = vld [vmem:[#allocation5 + $0x54] ss:$8 sps:$4 sm:$0xff]  }
  0xcb   : > { %v2941_v11 = vld [vmem:[#allocation5 + $0x50] ss:$8 sps:$4 sm:$0xff]   ;;  %v2942_v12 = vld [vmem:[#allocation5 + $0x64] ss:$8 sps:$4 sm:$0xff]   ;;  %v2944_v14 = vld [vmem:[#allocation5 + $0x60] ss:$8 sps:$4 sm:$0xff]  }
  0xcc   : > { %v2974_v13 = vld [vmem:[%s3744_s12 + $0x4] ss:$12 sps:$4 sm:$0xff]   ;;  %v2945_v15 = vld [vmem:[#allocation5 + $0x74] ss:$8 sps:$4 sm:$0xff]   ;;  %v2950_v18 = vld [vmem:[#allocation5 + $0x80] ss:$8 sps:$4 sm:$0xff]  }
  0xcd   : > { %945 = vmatpush1.bf16.msra.mxu0 %v2929_v3  ;;  %974 = vmatprep.mubr.bf16.mxu0 %v2974_v13  ;;  %v2947_v16 = vld [vmem:[#allocation5 + $0x70] ss:$8 sps:$4 sm:$0xff]   ;;  %v2948_v17 = vld [vmem:[#allocation5 + $0x84] ss:$8 sps:$4 sm:$0xff]   ;;  %v2951_v19 = vld [vmem:[#allocation5 + $0x94] ss:$8 sps:$4 sm:$0xff]  }
  0xce   : > { %946 = vmatprep.subr.bf16.mxu0 %v2930_v4  ;;  %v2953_v20 = vld [vmem:[#allocation5 + $0x90] ss:$8 sps:$4 sm:$0xff]   ;;  %v2954_v21 = vld [vmem:[#allocation5 + $0xa4] ss:$8 sps:$4 sm:$0xff]   ;;  %v2956_v22 = vld [vmem:[#allocation5 + $0xa0] ss:$8 sps:$4 sm:$0xff]  }
  0xcf   : > { %v2957_v23 = vld [vmem:[#allocation5 + $0xb4] ss:$8 sps:$4 sm:$0xff]   ;;  %v2959_v24 = vld [vmem:[#allocation5 + $0xb0] ss:$8 sps:$4 sm:$0xff]   ;;  %v2960_v25 = vld [vmem:[#allocation5 + $0xc4] ss:$8 sps:$4 sm:$0xff]  }
  0xd0   : > { %v2962_v26 = vld [vmem:[#allocation5 + $0xc0] ss:$8 sps:$4 sm:$0xff]   ;;  %v2963_v27 = vld [vmem:[#allocation5 + $0xd4] ss:$8 sps:$4 sm:$0xff]   ;;  %v2965_v28 = vld [vmem:[#allocation5 + $0xd0] ss:$8 sps:$4 sm:$0xff]  }
  0xd1   : > { %947 = vmatpush1.bf16.msra.mxu0 %v2932_v5  ;;  %v2966_v29 = vld [vmem:[#allocation5 + $0xe4] ss:$8 sps:$4 sm:$0xff]   ;;  %v2968_v30 = vld [vmem:[#allocation5 + $0xe0] ss:$8 sps:$4 sm:$0xff]   ;;  %v2969_v31 = vld [vmem:[#allocation5 + $0xf4] ss:$8 sps:$4 sm:$0xff]  }
  0xd2   : > { %948 = vmatprep.subr.bf16.mxu0 %v2933_v6  ;;  %v3028_v32 = vld [vmem:[#allocation7 + $0x4] ss:$8 sps:$4 sm:$0xff]   ;;  %v3030_v33 = vld [vmem:[#allocation7] ss:$8 sps:$4 sm:$0xff]   ;;  %v3031_v34 = vld [vmem:[#allocation7 + $0x14] ss:$8 sps:$4 sm:$0xff]  }
  0xd3   : > { %v2971_v35 = vld [vmem:[#allocation5 + $0xf0] ss:$8 sps:$4 sm:$0xff]   ;;  %v2977_v36 = vld [vmem:[#allocation5 + $0x104] ss:$8 sps:$4 sm:$0xff]   ;;  %1420 = vmatprep.subr.bf16.mxu1 %v3028_v32  ;;  %v2975_v40 = vld [vmem:[#allocation5 + $0x100] ss:$8 sps:$4 sm:$0xff]  }
  0xd4   : > { %1421 = vmatpush1.bf16.msra.mxu1 %v3030_v33  ;;  %v3033_v37 = vld [vmem:[#allocation7 + $0x10] ss:$8 sps:$4 sm:$0xff]   ;;  %v2972_v38 = vld [vmem:[%s3744_s12] ss:$12 sps:$4 sm:$0xff]   ;;  %v2978_v41 = vld [vmem:[%s3744_s12 + $0x1c] ss:$12 sps:$4 sm:$0xff]  }
  0xd5   : > { %949 = vmatpush1.bf16.msra.mxu0 %v2935_v7  ;;  %1422 = vmatprep.subr.bf16.mxu1 %v3031_v34  ;;  %v3034_v39 = vld [vmem:[#allocation7 + $0x24] ss:$8 sps:$4 sm:$0xff]   ;;  %v2983_v42 = vld [vmem:[#allocation5 + $0x114] ss:$8 sps:$4 sm:$0xff]   ;;  %v3036_v43 = vld [vmem:[#allocation7 + $0x20] ss:$8 sps:$4 sm:$0xff]  }
  0xd6   : > { %950 = vmatprep.subr.bf16.mxu0 %v2936_v8  ;;  %v3037_v44 = vld [vmem:[#allocation7 + $0x34] ss:$8 sps:$4 sm:$0xff]   ;;  %v2981_v45 = vld [vmem:[#allocation5 + $0x110] ss:$8 sps:$4 sm:$0xff]   ;;  %v2989_v46 = vld [vmem:[#allocation5 + $0x124] ss:$8 sps:$4 sm:$0xff]  }
  0xd7   : > { %v2980_v47 = vld [vmem:[%s3744_s12 + $0x18] ss:$12 sps:$4 sm:$0xff]   ;;  %v2984_v49 = vld [vmem:[%s3744_s12 + $0x34] ss:$12 sps:$4 sm:$0xff]   ;;  %v2986_v58 = vld [vmem:[%s3744_s12 + $0x30] ss:$12 sps:$4 sm:$0xff]  }
  0xd8   : > { %1423 = vmatpush1.bf16.msra.mxu1 %v3033_v37  ;;  %v3039_v48 = vld [vmem:[#allocation7 + $0x30] ss:$8 sps:$4 sm:$0xff]   ;;  %v2987_v50 = vld [vmem:[#allocation5 + $0x120] ss:$8 sps:$4 sm:$0xff]   ;;  %v3040_v51 = vld [vmem:[#allocation7 + $0x44] ss:$8 sps:$4 sm:$0xff]  }
  0xd9   : > { %951 = vmatpush1.bf16.msra.mxu0 %v2938_v9  ;;  %1424 = vmatprep.subr.bf16.mxu1 %v3034_v39  ;;  %v2995_v52 = vld [vmem:[#allocation5 + $0x134] ss:$8 sps:$4 sm:$0xff]   ;;  %v3042_v53 = vld [vmem:[#allocation7 + $0x40] ss:$8 sps:$4 sm:$0xff]   ;;  %v2993_v55 = vld [vmem:[#allocation5 + $0x130] ss:$8 sps:$4 sm:$0xff]  }
  0xda   : > { %952 = vmatprep.subr.bf16.mxu0 %v2939_v10  ;;  %v3043_v54 = vld [vmem:[#allocation7 + $0x54] ss:$8 sps:$4 sm:$0xff]   ;;  %v3001_v56 = vld [vmem:[#allocation5 + $0x144] ss:$8 sps:$4 sm:$0xff]   ;;  %v3045_v57 = vld [vmem:[#allocation7 + $0x50] ss:$8 sps:$4 sm:$0xff]  }
  0xdb   : > { %v3046_v59 = vld [vmem:[#allocation7 + $0x64] ss:$8 sps:$4 sm:$0xff]   ;;  %v2999_v61 = vld [vmem:[#allocation5 + $0x140] ss:$8 sps:$4 sm:$0xff]   ;;  %v3007_v62 = vld [vmem:[#allocation5 + $0x154] ss:$8 sps:$4 sm:$0xff]  }
  0xdc   : > { %1425 = vmatpush1.bf16.msra.mxu1 %v3036_v43  ;;  %v2990_v60 = vld [vmem:[%s3744_s12 + $0x4c] ss:$12 sps:$4 sm:$0xff]   ;;  %v3048_v63 = vld [vmem:[#allocation7 + $0x60] ss:$8 sps:$4 sm:$0xff]   ;;  %v3049_v0 = vld [vmem:[#allocation7 + $0x74] ss:$8 sps:$4 sm:$0xff]  }
  0xdd   : > { %953 = vmatpush1.bf16.msra.mxu0 %v2941_v11  ;;  %1426 = vmatprep.subr.bf16.mxu1 %v3037_v44  ;;  %v3005_v1 = vld [vmem:[#allocation5 + $0x150] ss:$8 sps:$4 sm:$0xff]   ;;  %v3013_v2 = vld [vmem:[#allocation5 + $0x164] ss:$8 sps:$4 sm:$0xff]   ;;  %v2992_v4 = vld [vmem:[%s3744_s12 + $0x48] ss:$12 sps:$4 sm:$0xff]  }
  0xde   : > { %954 = vmatprep.subr.bf16.mxu0 %v2942_v12  ;;  %v3051_v3 = vld [vmem:[#allocation7 + $0x70] ss:$8 sps:$4 sm:$0xff]   ;;  %v3052_v5 = vld [vmem:[#allocation7 + $0x84] ss:$8 sps:$4 sm:$0xff]   ;;  %v3011_v7 = vld [vmem:[#allocation5 + $0x160] ss:$8 sps:$4 sm:$0xff]  }
  0xdf   : > { %v2996_v6 = vld [vmem:[%s3744_s12 + $0x64] ss:$12 sps:$4 sm:$0xff]   ;;  %v3019_v8 = vld [vmem:[#allocation5 + $0x174] ss:$8 sps:$4 sm:$0xff]   ;;  %v3054_v9 = vld [vmem:[#allocation7 + $0x80] ss:$8 sps:$4 sm:$0xff]  }
  0xe0   : > { %1427 = vmatpush1.bf16.msra.mxu1 %v3039_v48  ;;  %v3055_v10 = vld [vmem:[#allocation7 + $0x94] ss:$8 sps:$4 sm:$0xff]   ;;  %v3017_v11 = vld [vmem:[#allocation5 + $0x170] ss:$8 sps:$4 sm:$0xff]   ;;  %v2998_v13 = vld [vmem:[%s3744_s12 + $0x60] ss:$12 sps:$4 sm:$0xff]  }
  0xe1   : > { %955 = vmatpush1.bf16.msra.mxu0 %v2944_v14  ;;  %1428 = vmatprep.subr.bf16.mxu1 %v3040_v51  ;;  %v3057_v12 = vld [vmem:[#allocation7 + $0x90] ss:$8 sps:$4 sm:$0xff]   ;;  %v3058_v14 = vld [vmem:[#allocation7 + $0xa4] ss:$8 sps:$4 sm:$0xff]   ;;  %v3024_v32 = vld [vmem:[%s3744_s12 + $0x68] ss:$12 sps:$4 sm:$0xff]  }
  0xe2   : > { %956 = vmatprep.subr.bf16.mxu0 %v2945_v15  ;;  %v3002_v15 = vld [vmem:[%s3744_s12 + $0x7c] ss:$12 sps:$4 sm:$0xff]   ;;  %v3025_v33 = vld [vmem:[%s3744_s12 + $0x80] ss:$12 sps:$4 sm:$0xff]   ;;  %v3026_v34 = vld [vmem:[%s3744_s12 + $0x98] ss:$12 sps:$4 sm:$0xff]  }
  0xe3   : > { %v3070_v37 = vld [vmem:[#allocation7 + $0xe4] ss:$8 sps:$4 sm:$0xff]   ;;  %v3073_v39 = vld [vmem:[#allocation7 + $0xf4] ss:$8 sps:$4 sm:$0xff]   ;;  %s4037_s3 = sld [smem:[#allocation21_spill]]  ;;  %s4038_s22 = sld [smem:[#allocation22_spill]] }
  0xe4   : > { %1429 = vmatpush1.bf16.msra.mxu1 %v3042_v53  ;;  %s2445_s10 = sshll.u32 %s3740_s28, 7  ;;  %s2590_s24 = sshll.u32 %s3519_s23, 11 }
  0xe5   : > { %957 = vmatpush1.bf16.msra.mxu0 %v2947_v16  ;;  %1430 = vmatprep.subr.bf16.mxu1 %v3043_v54  ;;  %v3060_v16 = vld [vmem:[#allocation7 + $0xa0] ss:$8 sps:$4 sm:$0xff]   ;;  %s4039_s29 = sld [smem:[#allocation23_spill]]  ;;  %s2294_s23 = scalar_lea.sflag [#allocation4], %s3740_s28 }
  0xe6   : > { %958 = vmatprep.subr.bf16.mxu0 %v2948_v17  ;;  %v3061_v17 = vld [vmem:[#allocation7 + $0xb4] ss:$8 sps:$4 sm:$0xff]   ;;  %p4040_p7 = scmp.ne.s32.totalorder %s4027_s25, 0  ;;  %s3435_s15 = smov [#allocation13]  }
  0xe8   : > { %1431 = vmatpush1.bf16.msra.mxu1 %v3045_v57 }
  0xe9   : > { %959 = vmatpush1.bf16.msra.mxu0 %v2950_v18  ;;  %1432 = vmatprep.subr.bf16.mxu1 %v3046_v59  ;;  %v3063_v18 = vld [vmem:[#allocation7 + $0xb0] ss:$8 sps:$4 sm:$0xff]  }
  0xea   : > { %960 = vmatprep.subr.bf16.mxu0 %v2951_v19  ;;  %v3004_v19 = vld [vmem:[%s3744_s12 + $0x78] ss:$12 sps:$4 sm:$0xff]  }
  0xeb   : > { %s3942_s27 = scalar_lea.hbm %s4039_s29, %s2590_s24 }
  0xec   : > { %1433 = vmatpush1.bf16.msra.mxu1 %v3048_v63 }
  0xed   : > { %961 = vmatpush1.bf16.msra.mxu0 %v2953_v20  ;;  %1434 = vmatprep.subr.bf16.mxu1 %v3049_v0  ;;  %v3064_v20 = vld [vmem:[#allocation7 + $0xc4] ss:$8 sps:$4 sm:$0xff]  }
  0xee   : > { %962 = vmatprep.subr.bf16.mxu0 %v2954_v21  ;;  %v3008_v21 = vld [vmem:[%s3744_s12 + $0x94] ss:$12 sps:$4 sm:$0xff]  }
  0xef   : > { %v3077_v0 = vld [vmem:[#allocation8] sm:$0xff]  }
  0xf0   : > { %1435 = vmatpush1.bf16.msra.mxu1 %v3051_v3  ;;  %v3078_v3 = vld [vmem:[#allocation8 + $0x48] sm:$0xff]  }
  0xf1   : > { %963 = vmatpush1.bf16.msra.mxu0 %v2956_v22  ;;  %1436 = vmatprep.subr.bf16.mxu1 %v3052_v5  ;;  %v3066_v22 = vld [vmem:[#allocation7 + $0xc0] ss:$8 sps:$4 sm:$0xff]  }
  0xf2   : > { %964 = vmatprep.subr.bf16.mxu0 %v2957_v23  ;;  %v3067_v23 = vld [vmem:[#allocation7 + $0xd4] ss:$8 sps:$4 sm:$0xff]  }
  0xf4   : > { %1437 = vmatpush1.bf16.msra.mxu1 %v3054_v9  ;;  %v3079_v9 = vld [vmem:[#allocation8 + $0x8] sm:$0xff]  }
  0xf5   : > { %965 = vmatpush1.bf16.msra.mxu0 %v2959_v24  ;;  %1438 = vmatprep.subr.bf16.mxu1 %v3055_v10  ;;  %v3010_v24 = vld [vmem:[%s3744_s12 + $0x90] ss:$12 sps:$4 sm:$0xff]  }
  0xf6   : > { %966 = vmatprep.subr.bf16.mxu0 %v2960_v25  ;;  %v3014_v25 = vld [vmem:[%s3744_s12 + $0xac] ss:$12 sps:$4 sm:$0xff]  }
  0xf8   : > { %1439 = vmatpush1.bf16.msra.mxu1 %v3057_v12  ;;  %v3080_v12 = vld [vmem:[#allocation8 + $0x50] sm:$0xff]  }
  0xf9   : > { %967 = vmatpush1.bf16.msra.mxu0 %v2962_v26  ;;  %1440 = vmatprep.subr.bf16.mxu1 %v3058_v14  ;;  %v3016_v26 = vld [vmem:[%s3744_s12 + $0xa8] ss:$12 sps:$4 sm:$0xff]  }
  0xfa   : > { %968 = vmatprep.subr.bf16.mxu0 %v2963_v27  ;;  %v3434_v27 = vmov 0  }
  0xfc   : > { %1441 = vmatpush1.bf16.msra.mxu1 %v3060_v16 }
  0xfd   : > { %969 = vmatpush1.bf16.msra.mxu0 %v2965_v28  ;;  %1442 = vmatprep.subr.bf16.mxu1 %v3061_v17  ;;  %v3020_v28 = vld [vmem:[%s3744_s12 + $0x8] ss:$12 sps:$4 sm:$0xff]  }
  0xfe   : > { %970 = vmatprep.subr.bf16.mxu0 %v2966_v29  ;;  %v3021_v29 = vld [vmem:[%s3744_s12 + $0x20] ss:$12 sps:$4 sm:$0xff]  }
 0x100   : > { %1443 = vmatpush1.bf16.msra.mxu1 %v3063_v18  ;;  %v3081_v18 = vld [vmem:[#allocation8 + $0x10] sm:$0xff]  }
 0x101   : > { %971 = vmatpush1.bf16.msra.mxu0 %v2968_v30  ;;  %1444 = vmatprep.subr.bf16.mxu1 %v3064_v20  ;;  %v3022_v30 = vld [vmem:[%s3744_s12 + $0x38] ss:$12 sps:$4 sm:$0xff]  }
 0x102   : > { %972 = vmatprep.subr.bf16.mxu0 %v2969_v31  ;;  %v3023_v31 = vld [vmem:[%s3744_s12 + $0x50] ss:$12 sps:$4 sm:$0xff]  }
 0x104   : > { %1445 = vmatpush1.bf16.msra.mxu1 %v3066_v22 }
 0x105   : > { %973 = vmatpush1.bf16.msra.mxu0 %v2971_v35  ;;  %1446 = vmatprep.subr.bf16.mxu1 %v3067_v23  ;;  %v3027_v35 = vld [vmem:[%s3744_s12 + $0xb0] ss:$12 sps:$4 sm:$0xff]   ;;  %s3914_s12 = scalar_lea.vmem [#allocation13], %s2445_s10 }
 0x106   : > { %1055 = vmatprep.subr.bf16.mxu0 %v2977_v36  ;;  %v3069_v36 = vld [vmem:[#allocation7 + $0xd0] ss:$8 sps:$4 sm:$0xff]   ;;  %s2307_s13 = sshll.u32 %s3914_s12, 4  ;;  %s3944_s13 = int_to_ptr.vmem [resolvable:$true] %s2307_s13 }
 0x107   : > { %s3342_s14 = scalar_lea.vmem %s3944_s13, 2048 }
 0x108   : > { %975 = vmatmul.mubr.bf16.vlgmr.msra.gmra.mrb[0].mxu0 %v2972_v38  ;;  %1447 = vmatpush1.bf16.msra.mxu1 %v3069_v36  ;;  %v3072_v38 = vld [vmem:[#allocation7 + $0xe0] ss:$8 sps:$4 sm:$0xff]   ;;  %p3343_p2 = scmp.ne.s32.totalorder %s3944_s13, %s3342_s14 }
 0x109   : > { %1056 = vmatpush1.bf16.msra.mxu0 %v2975_v40  ;;  %984 = vmatprep.mubr.bf16.mxu0 %v2978_v41  ;;  %v3075_v40 = vld [vmem:[#allocation7 + $0xf0] ss:$8 sps:$4 sm:$0xff]   ;;  %v3076_v41 = vld [vmem:[#allocation8 + $0x40] sm:$0xff]  }
 0x10a   : > { %1057 = vmatprep.subr.bf16.mxu0 %v2983_v42  ;;  %1448 = vmatprep.subr.bf16.mxu1 %v3070_v37  ;;  %v564_v42 = vlaneseq  ;;  %v3085_v36 = vld [vmem:[#allocation8 + $0x20] sm:$0xff]   ;;  %p3344_p10 = pnand %p3343_p2, %p4040_p7 }
 0x10c   : > { %1449 = vmatpush1.bf16.msra.mxu1 %v3072_v38  ;;  %v3786_v43 = vshrl.u32 %v564_v42, 7  ;;  %p3345_p1 = pneg %p3344_p10 }
 0x10d   : > { %1058 = vmatpush1.bf16.msra.mxu0 %v2981_v45  ;;  %1450 = vmatprep.subr.bf16.mxu1 %v3073_v39  ;;  %v562_v45 = vld [vmem:[%s3993_s2] sm:$0x3]  ;;  %v3086_v39 = vld [vmem:[#allocation8 + $0x68] sm:$0xff]  }
 0x10e   : > { %1059 = vmatprep.subr.bf16.mxu0 %v2989_v46  ;;  %v566_v44 = vsub.s32 0, %v3786_v43  ;;  %v570_v46 = vsub.s32 1, %v3786_v43 }
 0x110   : > { %985 = vmatmul.mubr.bf16.gmra.mrb[4].mxu0 %v2980_v47  ;;  %1451 = vmatpush1.bf16.msra.mxu1 %v3075_v40  ;;  %v3795_v47 = vrot.slane %v562_v45, %v566_v44  ;;  %v3799_v48 = vrot.slane %v562_v45, %v570_v46 }
 0x111   : > { %994 = vmatprep.mubr.bf16.mxu0 %v2984_v49  ;;  %1060 = vmatpush1.bf16.msra.mxu0 %v2987_v50 }
 0x112   : > { %1061 = vmatprep.subr.bf16.mxu0 %v2995_v52  ;;  %2591 = vmatprep.subr.bf16.mxu1 %v3076_v41 }
 0x115   : > { %1062 = vmatpush1.bf16.msra.mxu0 %v2993_v55 }
 0x116   : > { %1063 = vmatprep.subr.bf16.mxu0 %v3001_v56 }
 0x118   : > { %995 = vmatmul.mubr.bf16.gmra.mrb[8].mxu0 %v2986_v58 }
 0x119   : > { %1004 = vmatprep.mubr.bf16.mxu0 %v2990_v60  ;;  %1064 = vmatpush1.bf16.msra.mxu0 %v2999_v61 }
 0x11a   : > { %1065 = vmatprep.subr.bf16.mxu0 %v3007_v62 }
 0x11d   : > { %1066 = vmatpush1.bf16.msra.mxu0 %v3005_v1 }
 0x11e   : > { %1067 = vmatprep.subr.bf16.mxu0 %v3013_v2 }
 0x120   : > { %1005 = vmatmul.mubr.bf16.gmra.mrb[12].mxu0 %v2992_v4 }
 0x121   : > { %1014 = vmatprep.mubr.bf16.mxu0 %v2996_v6  ;;  %1068 = vmatpush1.bf16.msra.mxu0 %v3011_v7 }
 0x122   : > { %1069 = vmatprep.subr.bf16.mxu0 %v3019_v8 }
 0x125   : > { %1070 = vmatpush1.bf16.msra.mxu0 %v3017_v11 }
 0x128   : > { %1015 = vmatmul.mubr.bf16.gmra.mrb[16].mxu0 %v2998_v13 }
 0x129   : > { %1024 = vmatprep.mubr.bf16.mxu0 %v3002_v15 }
 0x130   : > { %1025 = vmatmul.mubr.bf16.gmra.mrb[20].mxu0 %v3004_v19 }
 0x131   : > { %1034 = vmatprep.mubr.bf16.mxu0 %v3008_v21  ;;  %v3082_v21 = vld [vmem:[#allocation8 + $0x58] sm:$0xff]  }
 0x138   : > { %1035 = vmatmul.mubr.bf16.gmra.mrb[24].mxu0 %v3010_v24 }
 0x139   : > { %1044 = vmatprep.mubr.bf16.mxu0 %v3014_v25 }
 0x140   : > { %1045 = vmatmul.mubr.bf16.gmra.mrb[28].mxu0 %v3016_v26 }
 0x141   : > { %1087 = vmatprep.mubr.bf16.mxu0 %v3434_v27 }
 0x148   : > { %1088 = vmatmul.mubr.bf16.vlgmr.msra.gmra.mrb[0].mxu0 %v3020_v28 }
 0x149   : > { %1097 = vmatprep.mubr.bf16.mxu0 %v3434_v27 }
 0x150   : > { %1098 = vmatmul.mubr.bf16.gmra.mrb[4].mxu0 %v3021_v29 }
 0x151   : > { %1107 = vmatprep.mubr.bf16.mxu0 %v3434_v27 }
 0x158   : > { %1108 = vmatmul.mubr.bf16.gmra.mrb[8].mxu0 %v3022_v30  ;;  %v3084_v30 = vld [vmem:[#allocation8 + $0x60] sm:$0xff]  }
 0x159   : > { %1117 = vmatprep.mubr.bf16.mxu0 %v3434_v27 }
 0x160   : > { %1118 = vmatmul.mubr.bf16.gmra.mrb[12].mxu0 %v3023_v31 }
 0x161   : > { %1127 = vmatprep.mubr.bf16.mxu0 %v3434_v27 }
 0x168   : > { %1128 = vmatmul.mubr.bf16.gmra.mrb[16].mxu0 %v3024_v32 }
 0x169   : > { %1137 = vmatprep.mubr.bf16.mxu0 %v3434_v27 }
 0x170   : > { %1138 = vmatmul.mubr.bf16.gmra.mrb[20].mxu0 %v3025_v33 }
 0x171   : > { %1147 = vmatprep.mubr.bf16.mxu0 %v3434_v27 }
 0x178   : > { %1148 = vmatmul.mubr.bf16.gmra.mrb[24].mxu0 %v3026_v34 }
 0x179   : > { %1157 = vmatprep.mubr.bf16.mxu0 %v3434_v27  ;;  %v3083_v27 = vld [vmem:[#allocation8 + $0x18] sm:$0xff]  }
 0x180   : > { %1158 = vmatmul.mubr.bf16.gmra.mrb[28].mxu0 %v3027_v35 }
 0x21b   : > { %v1089_v49 = vpop.f32.mrb[0].mxu0 }
 0x21c   : > { %v2751_v50 = vadd.f32 %v1089_v49, %v3795_v47  ;;  %v1091_v51 = vpop.f32.mrb[1].mxu0 }
 0x21d   : > { %v2752_v52 = vadd.f32 %v1091_v51, %v3799_v48  ;;  %v1093_v53 = vpop.f32.mrb[2].mxu0 }
 0x21e   : > { %v2753_v54 = vadd.f32 %v1093_v53, %v3795_v47  ;;  %v1095_v55 = vpop.f32.mrb[3].mxu0  ;;  %v1168_v57 = vmax.f32 %v2751_v50, 0.0  ;;  %v3087_v50 = vld [vmem:[#allocation8 + $0x28] sm:$0xff]   ;;  %v3088_v53 = vld [vmem:[#allocation8 + $0x70] sm:$0xff]  }
 0x21f   : > { %v2754_v56 = vadd.f32 %v1095_v55, %v3799_v48  ;;  %v1169_v59 = vmax.f32 %v2752_v52, 0.0 }
 0x220   : > { %v1170_v58 = vmax.f32 %v2753_v54, 0.0 }
 0x221   : > { %v1171_v60 = vmax.f32 %v2754_v56, 0.0 }
 0x222   : > { %v1200_v61 = vpack.c.bf16 %v1170_v58, %v1168_v57 }
 0x223   : > { %v1099_v62 = vpop.f32.mrb[4].mxu0  ;;  %v1201_v63 = vpack.c.bf16 %v1171_v60, %v1169_v59  ;;  %v3089_v59 = vld [vmem:[#allocation8 + $0x30] sm:$0xff]  }
 0x224   : > { %v2755_v1 = vadd.f32 %v1099_v62, %v3795_v47  ;;  %v1101_v2 = vpop.f32.mrb[5].mxu0 }
 0x225   : > { %v2756_v4 = vadd.f32 %v1101_v2, %v3799_v48  ;;  %v1103_v5 = vpop.f32.mrb[6].mxu0  ;;  %1452 = vmatprep.mubr.bf16.mxu1 %v1201_v63 }
 0x226   : > { %v2757_v6 = vadd.f32 %v1103_v5, %v3795_v47  ;;  %v1105_v7 = vpop.f32.mrb[7].mxu0  ;;  %1453 = vmatmul.mubr.bf16.vlgmr.msra.gmra.mrb[0].mxu1 %v1200_v61  ;;  %v1172_v10 = vmax.f32 %v2755_v1, 0.0 }
 0x227   : > { %v2758_v8 = vadd.f32 %v1105_v7, %v3799_v48  ;;  %2592 = vmatpush3.bf16.msra.mxu1 %v3077_v0  ;;  %v1173_v13 = vmax.f32 %v2756_v4, 0.0 }
 0x228   : > { %v1174_v11 = vmax.f32 %v2757_v6, 0.0  ;;  %2593 = vmatprep.subr.bf16.mxu1 %v3078_v3 }
 0x229   : > { %v1175_v14 = vmax.f32 %v2758_v8, 0.0 }
 0x22a   : > { %v1202_v15 = vpack.c.bf16 %v1174_v11, %v1172_v10 }
 0x22b   : > { %v1203_v16 = vpack.c.bf16 %v1175_v14, %v1173_v13  ;;  %v1109_v17 = vpop.f32.mrb[8].mxu0  ;;  %2594 = vmatpush3.bf16.msra.mxu1 %v3079_v9 }
 0x22c   : > { %v2759_v19 = vadd.f32 %v1109_v17, %v3795_v47  ;;  %v1111_v20 = vpop.f32.mrb[9].mxu0  ;;  %2595 = vmatprep.subr.bf16.mxu1 %v3080_v12 }
 0x22d   : > { %v2760_v22 = vadd.f32 %v1111_v20, %v3799_v48  ;;  %v1113_v23 = vpop.f32.mrb[10].mxu0  ;;  %1462 = vmatprep.mubr.bf16.mxu1 %v1203_v16 }
 0x22e   : > { %v2761_v24 = vadd.f32 %v1113_v23, %v3795_v47  ;;  %v1115_v25 = vpop.f32.mrb[11].mxu0  ;;  %1463 = vmatmul.mubr.bf16.gmra.mrb[4].mxu1 %v1202_v15  ;;  %v1176_v28 = vmax.f32 %v2759_v19, 0.0 }
 0x22f   : > { %v2762_v26 = vadd.f32 %v1115_v25, %v3799_v48  ;;  %2596 = vmatpush3.bf16.msra.mxu1 %v3081_v18  ;;  %v1177_v31 = vmax.f32 %v2760_v22, 0.0 }
 0x230   : > { %v1178_v29 = vmax.f32 %v2761_v24, 0.0  ;;  %2597 = vmatprep.subr.bf16.mxu1 %v3082_v21 }
 0x231   : > { %v1179_v32 = vmax.f32 %v2762_v26, 0.0 }
 0x232   : > { %v1204_v33 = vpack.c.bf16 %v1178_v29, %v1176_v28 }
 0x233   : > { %v1205_v34 = vpack.c.bf16 %v1179_v32, %v1177_v31  ;;  %v1119_v35 = vpop.f32.mrb[12].mxu0  ;;  %2598 = vmatpush3.bf16.msra.mxu1 %v3083_v27 }
 0x234   : > { %v2763_v37 = vadd.f32 %v1119_v35, %v3795_v47  ;;  %v1121_v38 = vpop.f32.mrb[13].mxu0  ;;  %2599 = vmatprep.subr.bf16.mxu1 %v3084_v30 }
 0x235   : > { %v2764_v40 = vadd.f32 %v1121_v38, %v3799_v48  ;;  %v1123_v41 = vpop.f32.mrb[14].mxu0  ;;  %1472 = vmatprep.mubr.bf16.mxu1 %v1205_v34 }
 0x236   : > { %v2765_v42 = vadd.f32 %v1123_v41, %v3795_v47  ;;  %v1125_v45 = vpop.f32.mrb[15].mxu0  ;;  %1473 = vmatmul.mubr.bf16.gmra.mrb[8].mxu1 %v1204_v33  ;;  %v1180_v51 = vmax.f32 %v2763_v37, 0.0 }
 0x237   : > { %v2766_v49 = vadd.f32 %v1125_v45, %v3799_v48  ;;  %2600 = vmatpush3.bf16.msra.mxu1 %v3085_v36  ;;  %v1181_v54 = vmax.f32 %v2764_v40, 0.0 }
 0x238   : > { %v1182_v52 = vmax.f32 %v2765_v42, 0.0  ;;  %2601 = vmatprep.subr.bf16.mxu1 %v3086_v39 }
 0x239   : > { %v1183_v55 = vmax.f32 %v2766_v49, 0.0 }
 0x23a   : > { %v1206_v56 = vpack.c.bf16 %v1182_v52, %v1180_v51 }
 0x23b   : > { %v1207_v57 = vpack.c.bf16 %v1183_v55, %v1181_v54  ;;  %v1129_v58 = vpop.f32.mrb[16].mxu0  ;;  %2602 = vmatpush3.bf16.msra.mxu1 %v3087_v50 }
 0x23c   : > { %v2767_v60 = vadd.f32 %v1129_v58, %v3795_v47  ;;  %v1131_v61 = vpop.f32.mrb[17].mxu0  ;;  %2603 = vmatprep.subr.bf16.mxu1 %v3088_v53  ;;  %v3092_v58 = vld [vmem:[#allocation10] sm:$0xff]  }
 0x23d   : > { %v2768_v62 = vadd.f32 %v1131_v61, %v3799_v48  ;;  %v1133_v63 = vpop.f32.mrb[18].mxu0  ;;  %1482 = vmatprep.mubr.bf16.mxu1 %v1207_v57  ;;  %v3091_v57 = vld [vmem:[#allocation8 + $0x38] sm:$0xff]   ;;  %2687 = vmatprep.subr.bf16.mxu0 %v3092_v58 }
 0x23e   : > { %v2769_v0 = vadd.f32 %v1133_v63, %v3795_v47  ;;  %v1135_v1 = vpop.f32.mrb[19].mxu0  ;;  %1483 = vmatmul.mubr.bf16.gmra.mrb[12].mxu1 %v1206_v56  ;;  %v1184_v3 = vmax.f32 %v2767_v60, 0.0  ;;  %v3090_v56 = vld [vmem:[#allocation8 + $0x78] sm:$0xff]   ;;  %2688 = vmatpush3.bf16.msra.mxu0 %v3092_v58 }
 0x23f   : > { %v2770_v2 = vadd.f32 %v1135_v1, %v3799_v48  ;;  %2604 = vmatpush3.bf16.msra.mxu1 %v3089_v59  ;;  %v1185_v5 = vmax.f32 %v2768_v62, 0.0  ;;  %v3093_v59 = vld [vmem:[#allocation10 + $0x8] sm:$0xff]  }
 0x240   : > { %v1186_v4 = vmax.f32 %v2769_v0, 0.0  ;;  %2605 = vmatprep.subr.bf16.mxu1 %v3090_v56  ;;  %2689 = vmatprep.subr.bf16.mxu0 %v3093_v59 }
 0x241   : > { %v1187_v6 = vmax.f32 %v2770_v2, 0.0 }
 0x242   : > { %v1208_v7 = vpack.c.bf16 %v1186_v4, %v1184_v3  ;;  %2690 = vmatpush3.bf16.msra.mxu0 %v3093_v59 }
 0x243   : > { %v1209_v8 = vpack.c.bf16 %v1187_v6, %v1185_v5  ;;  %v1139_v9 = vpop.f32.mrb[20].mxu0  ;;  %2606 = vmatpush3.bf16.msra.mxu1 %v3091_v57 }
 0x244   : > { %v2771_v10 = vadd.f32 %v1139_v9, %v3795_v47  ;;  %v1141_v11 = vpop.f32.mrb[21].mxu0 }
 0x245   : > { %v2772_v12 = vadd.f32 %v1141_v11, %v3799_v48  ;;  %v1143_v13 = vpop.f32.mrb[22].mxu0  ;;  %1492 = vmatprep.mubr.bf16.mxu1 %v1209_v8 }
 0x246   : > { %v2773_v14 = vadd.f32 %v1143_v13, %v3795_v47  ;;  %v1145_v15 = vpop.f32.mrb[23].mxu0  ;;  %1493 = vmatmul.mubr.bf16.gmra.mrb[16].mxu1 %v1208_v7  ;;  %v1188_v17 = vmax.f32 %v2771_v10, 0.0 }
 0x247   : > { %v2774_v16 = vadd.f32 %v1145_v15, %v3799_v48  ;;  %v1189_v19 = vmax.f32 %v2772_v12, 0.0 }
 0x248   : > { %v1190_v18 = vmax.f32 %v2773_v14, 0.0 }
 0x249   : > { %v1191_v20 = vmax.f32 %v2774_v16, 0.0 }
 0x24a   : > { %v1210_v21 = vpack.c.bf16 %v1190_v18, %v1188_v17 }
 0x24b   : > { %v1211_v22 = vpack.c.bf16 %v1191_v20, %v1189_v19  ;;  %v1149_v23 = vpop.f32.mrb[24].mxu0 }
 0x24c   : > { %v2775_v24 = vadd.f32 %v1149_v23, %v3795_v47  ;;  %v1151_v25 = vpop.f32.mrb[25].mxu0 }
 0x24d   : > { %v2776_v26 = vadd.f32 %v1151_v25, %v3799_v48  ;;  %v1153_v27 = vpop.f32.mrb[26].mxu0  ;;  %1502 = vmatprep.mubr.bf16.mxu1 %v1211_v22 }
 0x24e   : > { %v2777_v28 = vadd.f32 %v1153_v27, %v3795_v47  ;;  %v1155_v29 = vpop.f32.mrb[27].mxu0  ;;  %1503 = vmatmul.mubr.bf16.gmra.mrb[20].mxu1 %v1210_v21  ;;  %v1192_v31 = vmax.f32 %v2775_v24, 0.0 }
 0x24f   : > { %v2778_v30 = vadd.f32 %v1155_v29, %v3799_v48  ;;  %v1193_v33 = vmax.f32 %v2776_v26, 0.0 }
 0x250   : > { %v1194_v32 = vmax.f32 %v2777_v28, 0.0 }
 0x251   : > { %v1195_v34 = vmax.f32 %v2778_v30, 0.0 }
 0x252   : > { %v1212_v35 = vpack.c.bf16 %v1194_v32, %v1192_v31 }
 0x253   : > { %v1213_v36 = vpack.c.bf16 %v1195_v34, %v1193_v33  ;;  %v1159_v37 = vpop.f32.mrb[28].mxu0 }
 0x254   : > { %v2779_v38 = vadd.f32 %v1159_v37, %v3795_v47  ;;  %v1161_v39 = vpop.f32.mrb[29].mxu0 }
 0x255   : > { %v2780_v40 = vadd.f32 %v1161_v39, %v3799_v48  ;;  %v1163_v41 = vpop.f32.mrb[30].mxu0  ;;  %1512 = vmatprep.mubr.bf16.mxu1 %v1213_v36 }
 0x256   : > { %v2781_v42 = vadd.f32 %v1163_v41, %v3795_v47  ;;  %v1165_v45 = vpop.f32.mrb[31].mxu0  ;;  %1513 = vmatmul.mubr.bf16.gmra.mrb[24].mxu1 %v1212_v35  ;;  %v1196_v50 = vmax.f32 %v2779_v38, 0.0  ;;  %v3094_v47 = vld [vmem:[#allocation10 + $0x10] sm:$0xff]  }
 0x257   : > { %v2782_v49 = vadd.f32 %v1165_v45, %v3799_v48  ;;  %v1197_v52 = vmax.f32 %v2780_v40, 0.0  ;;  %2691 = vmatprep.subr.bf16.mxu0 %v3094_v47  ;;  %v1248_v48 = vld [vmem:[%s3995_s4] sm:$0x3] }
 0x258   : > { %v1198_v51 = vmax.f32 %v2781_v42, 0.0  ;;  %2692 = vmatpush3.bf16.msra.mxu0 %v3094_v47  ;;  %v3838_v60 = vrot.slane %v1248_v48, %v566_v44  ;;  %v3842_v61 = vrot.slane %v1248_v48, %v570_v46 }
 0x259   : > { %v1199_v53 = vmax.f32 %v2782_v49, 0.0 }
 0x25a   : > { %v1214_v54 = vpack.c.bf16 %v1198_v51, %v1196_v50 }
 0x25b   : > { %v1215_v55 = vpack.c.bf16 %v1199_v53, %v1197_v52 }
 0x25d   : > { %1522 = vmatprep.mubr.bf16.mxu1 %v1215_v55 }
 0x25e   : > { %1523 = vmatmul.mubr.bf16.gmra.mrb[28].mxu1 %v1214_v54 }
 0x2f9   : > { %v1454_v62 = vpop.f32.mrb[0].mxu1 }
 0x2fa   : > { %v1455_v63 = vadd.f32 %v1454_v62, %v3838_v60  ;;  %v1456_v0 = vpop.f32.mrb[1].mxu1 }
 0x2fb   : > { %v1457_v1 = vadd.f32 %v1456_v0, %v3842_v61  ;;  %v1458_v2 = vpop.f32.mrb[2].mxu1 }
 0x2fc   : > { %v1459_v3 = vadd.f32 %v1458_v2, %v3838_v60  ;;  %v1460_v4 = vpop.f32.mrb[3].mxu1  ;;  %v1533_v6 = vmax.f32 %v1455_v63, 0.0 }
 0x2fd   : > { %v1461_v5 = vadd.f32 %v1460_v4, %v3842_v61  ;;  %v1534_v44 = vmax.f32 %v1457_v1, 0.0 }
 0x2fe   : > { %v1535_v7 = vmax.f32 %v1459_v3, 0.0 }
 0x2ff   : > { %v1536_v8 = vmax.f32 %v1461_v5, 0.0 }
 0x300   : > { %v1565_v9 = vpack.c.bf16 %v1535_v7, %v1533_v6 }
 0x301   : > { %v1566_v43 = vpack.c.bf16 %v1536_v8, %v1534_v44  ;;  %v1464_v46 = vpop.f32.mrb[4].mxu1 }
 0x302   : > { %v1465_v10 = vadd.f32 %v1464_v46, %v3838_v60  ;;  %v1466_v11 = vpop.f32.mrb[5].mxu1 }
 0x303   : > { %v1467_v12 = vadd.f32 %v1466_v11, %v3842_v61  ;;  %v1468_v13 = vpop.f32.mrb[6].mxu1  ;;  %1748 = vmatprep.mubr.bf16.mxu1 %v1566_v43 }
 0x304   : > { %v1469_v14 = vadd.f32 %v1468_v13, %v3838_v60  ;;  %v1470_v15 = vpop.f32.mrb[7].mxu1  ;;  %1749 = vmatmul.mubr.bf16.vlgmr.msra.gmra.mrb[32].mxu1 %v1565_v9  ;;  %v1537_v17 = vmax.f32 %v1465_v10, 0.0 }
 0x305   : > { %v1471_v16 = vadd.f32 %v1470_v15, %v3842_v61  ;;  %v1538_v19 = vmax.f32 %v1467_v12, 0.0 }
 0x306   : > { %v1539_v18 = vmax.f32 %v1469_v14, 0.0 }
 0x307   : > { %v1540_v20 = vmax.f32 %v1471_v16, 0.0 }
 0x308   : > { %v1567_v21 = vpack.c.bf16 %v1539_v18, %v1537_v17 }
 0x309   : > { %v1568_v22 = vpack.c.bf16 %v1540_v20, %v1538_v19  ;;  %v1474_v23 = vpop.f32.mrb[8].mxu1 }
 0x30a   : > { %v1475_v24 = vadd.f32 %v1474_v23, %v3838_v60  ;;  %v1476_v25 = vpop.f32.mrb[9].mxu1 }
 0x30b   : > { %v1477_v26 = vadd.f32 %v1476_v25, %v3842_v61  ;;  %v1478_v27 = vpop.f32.mrb[10].mxu1  ;;  %1756 = vmatprep.mubr.bf16.mxu1 %v1568_v22 }
 0x30c   : > { %v1479_v28 = vadd.f32 %v1478_v27, %v3838_v60  ;;  %v1480_v29 = vpop.f32.mrb[11].mxu1  ;;  %1757 = vmatmul.mubr.bf16.gmra.mrb[36].mxu1 %v1567_v21  ;;  %v1541_v31 = vmax.f32 %v1475_v24, 0.0 }
 0x30d   : > { %v1481_v30 = vadd.f32 %v1480_v29, %v3842_v61  ;;  %v1542_v33 = vmax.f32 %v1477_v26, 0.0 }
 0x30e   : > { %v1543_v32 = vmax.f32 %v1479_v28, 0.0 }
 0x30f   : > { %v1544_v34 = vmax.f32 %v1481_v30, 0.0 }
 0x310   : > { %v1569_v35 = vpack.c.bf16 %v1543_v32, %v1541_v31 }
 0x311   : > { %v1570_v36 = vpack.c.bf16 %v1544_v34, %v1542_v33  ;;  %v1484_v37 = vpop.f32.mrb[12].mxu1 }
 0x312   : > { %v1485_v38 = vadd.f32 %v1484_v37, %v3838_v60  ;;  %v1486_v39 = vpop.f32.mrb[13].mxu1 }
 0x313   : > { %v1487_v40 = vadd.f32 %v1486_v39, %v3842_v61  ;;  %v1488_v41 = vpop.f32.mrb[14].mxu1  ;;  %1764 = vmatprep.mubr.bf16.mxu1 %v1570_v36 }
 0x314   : > { %v1489_v42 = vadd.f32 %v1488_v41, %v3838_v60  ;;  %v1490_v45 = vpop.f32.mrb[15].mxu1  ;;  %1765 = vmatmul.mubr.bf16.gmra.mrb[40].mxu1 %v1569_v35  ;;  %v1545_v50 = vmax.f32 %v1485_v38, 0.0 }
 0x315   : > { %v1491_v49 = vadd.f32 %v1490_v45, %v3842_v61  ;;  %v1546_v52 = vmax.f32 %v1487_v40, 0.0 }
 0x316   : > { %v1547_v51 = vmax.f32 %v1489_v42, 0.0 }
 0x317   : > { %v1548_v53 = vmax.f32 %v1491_v49, 0.0 }
 0x318   : > { %v1571_v54 = vpack.c.bf16 %v1547_v51, %v1545_v50  ;;  %v3095_v50 = vld [vmem:[#allocation10 + $0x18] sm:$0xff]   ;;  %v3096_v51 = vld [vmem:[#allocation10 + $0x20] sm:$0xff]  }
 0x319   : > { %v1572_v55 = vpack.c.bf16 %v1548_v53, %v1546_v52  ;;  %v1494_v56 = vpop.f32.mrb[16].mxu1  ;;  %2693 = vmatprep.subr.bf16.mxu0 %v3095_v50  ;;  %v3097_v52 = vld [vmem:[#allocation10 + $0x28] sm:$0xff]   ;;  %v3100_v53 = vld [vmem:[#allocation11] sm:$0xff]  }
 0x31a   : > { %v1495_v57 = vadd.f32 %v1494_v56, %v3838_v60  ;;  %v1496_v58 = vpop.f32.mrb[17].mxu1  ;;  %2694 = vmatpush3.bf16.msra.mxu0 %v3095_v50  ;;  %2719 = vmatprep.subr.bf16.mxu1 %v3100_v53  ;;  %v3103_v56 = vld [vmem:[#allocation11 + $0x18] sm:$0xff]  }
 0x31b   : > { %v1497_v59 = vadd.f32 %v1496_v58, %v3842_v61  ;;  %v1498_v47 = vpop.f32.mrb[18].mxu1  ;;  %1772 = vmatprep.mubr.bf16.mxu1 %v1572_v55  ;;  %2695 = vmatprep.subr.bf16.mxu0 %v3096_v51  ;;  %v3102_v55 = vld [vmem:[#allocation11 + $0x10] sm:$0xff]   ;;  %v3105_v58 = vld [vmem:[#allocation11 + $0x28] sm:$0xff]  }
 0x31c   : > { %v1499_v48 = vadd.f32 %v1498_v47, %v3838_v60  ;;  %v1500_v62 = vpop.f32.mrb[19].mxu1  ;;  %1773 = vmatmul.mubr.bf16.gmra.mrb[44].mxu1 %v1571_v54  ;;  %v1549_v0 = vmax.f32 %v1495_v57, 0.0  ;;  %v3101_v54 = vld [vmem:[#allocation11 + $0x8] sm:$0xff]   ;;  %v3104_v57 = vld [vmem:[#allocation11 + $0x20] sm:$0xff]  }
 0x31d   : > { %v1501_v63 = vadd.f32 %v1500_v62, %v3842_v61  ;;  %v1550_v2 = vmax.f32 %v1497_v59, 0.0  ;;  %2720 = vmatpush3.bf16.msra.mxu1 %v3100_v53  ;;  %v3879_v47 = vld [vmem:[%s3997_s6] ss:$0 sm:$0xff] }
 0x31e   : > { %v1551_v1 = vmax.f32 %v1499_v48, 0.0  ;;  %2696 = vmatpush3.bf16.msra.mxu0 %v3096_v51  ;;  %2721 = vmatprep.subr.bf16.mxu1 %v3101_v54 }
 0x31f   : > { %v1552_v3 = vmax.f32 %v1501_v63, 0.0  ;;  %2697 = vmatprep.subr.bf16.mxu0 %v3097_v52 }
 0x320   : > { %v1573_v4 = vpack.c.bf16 %v1551_v1, %v1549_v0 }
 0x321   : > { %v1574_v5 = vpack.c.bf16 %v1552_v3, %v1550_v2  ;;  %v1504_v6 = vpop.f32.mrb[20].mxu1  ;;  %2722 = vmatpush3.bf16.msra.mxu1 %v3101_v54 }
 0x322   : > { %v1505_v7 = vadd.f32 %v1504_v6, %v3838_v60  ;;  %v1506_v44 = vpop.f32.mrb[21].mxu1  ;;  %2698 = vmatpush3.bf16.msra.mxu0 %v3097_v52  ;;  %2723 = vmatprep.subr.bf16.mxu1 %v3102_v55 }
 0x323   : > { %v1507_v8 = vadd.f32 %v1506_v44, %v3842_v61  ;;  %v1508_v9 = vpop.f32.mrb[22].mxu1  ;;  %1780 = vmatprep.mubr.bf16.mxu1 %v1574_v5 }
 0x324   : > { %v1509_v43 = vadd.f32 %v1508_v9, %v3838_v60  ;;  %v1510_v46 = vpop.f32.mrb[23].mxu1  ;;  %1781 = vmatmul.mubr.bf16.gmra.mrb[48].mxu1 %v1573_v4  ;;  %v1553_v11 = vmax.f32 %v1505_v7, 0.0 }
 0x325   : > { %v1511_v10 = vadd.f32 %v1510_v46, %v3842_v61  ;;  %v1554_v13 = vmax.f32 %v1507_v8, 0.0  ;;  %2724 = vmatpush3.bf16.msra.mxu1 %v3102_v55 }
 0x326   : > { %v1555_v12 = vmax.f32 %v1509_v43, 0.0  ;;  %2725 = vmatprep.subr.bf16.mxu1 %v3103_v56 }
 0x327   : > { %v1556_v14 = vmax.f32 %v1511_v10, 0.0 }
 0x328   : > { %v1575_v15 = vpack.c.bf16 %v1555_v12, %v1553_v11 }
 0x329   : > { %v1576_v16 = vpack.c.bf16 %v1556_v14, %v1554_v13  ;;  %v1514_v17 = vpop.f32.mrb[24].mxu1  ;;  %2726 = vmatpush3.bf16.msra.mxu1 %v3103_v56 }
 0x32a   : > { %v1515_v18 = vadd.f32 %v1514_v17, %v3838_v60  ;;  %v1516_v19 = vpop.f32.mrb[25].mxu1  ;;  %2727 = vmatprep.subr.bf16.mxu1 %v3104_v57 }
 0x32b   : > { %v1517_v20 = vadd.f32 %v1516_v19, %v3842_v61  ;;  %v1518_v21 = vpop.f32.mrb[26].mxu1  ;;  %1788 = vmatprep.mubr.bf16.mxu1 %v1576_v16 }
 0x32c   : > { %v1519_v22 = vadd.f32 %v1518_v21, %v3838_v60  ;;  %v1520_v23 = vpop.f32.mrb[27].mxu1  ;;  %1789 = vmatmul.mubr.bf16.gmra.mrb[52].mxu1 %v1575_v15  ;;  %v1557_v25 = vmax.f32 %v1515_v18, 0.0 }
 0x32d   : > { %v1521_v24 = vadd.f32 %v1520_v23, %v3842_v61  ;;  %v1558_v27 = vmax.f32 %v1517_v20, 0.0  ;;  %2728 = vmatpush3.bf16.msra.mxu1 %v3104_v57 }
 0x32e   : > { %v1559_v26 = vmax.f32 %v1519_v22, 0.0  ;;  %2729 = vmatprep.subr.bf16.mxu1 %v3105_v58 }
 0x32f   : > { %v1560_v28 = vmax.f32 %v1521_v24, 0.0 }
 0x330   : > { %v1577_v29 = vpack.c.bf16 %v1559_v26, %v1557_v25 }
 0x331   : > { %v1578_v30 = vpack.c.bf16 %v1560_v28, %v1558_v27  ;;  %v1524_v31 = vpop.f32.mrb[28].mxu1  ;;  %2730 = vmatpush3.bf16.msra.mxu1 %v3105_v58 }
 0x332   : > { %v1525_v32 = vadd.f32 %v1524_v31, %v3838_v60  ;;  %v1526_v33 = vpop.f32.mrb[29].mxu1 }
 0x333   : > { %v1527_v34 = vadd.f32 %v1526_v33, %v3842_v61  ;;  %v1528_v35 = vpop.f32.mrb[30].mxu1  ;;  %1796 = vmatprep.mubr.bf16.mxu1 %v1578_v30 }
 0x334   : > { %v1529_v36 = vadd.f32 %v1528_v35, %v3838_v60  ;;  %v1530_v37 = vpop.f32.mrb[31].mxu1  ;;  %1797 = vmatmul.mubr.bf16.gmra.mrb[56].mxu1 %v1577_v29  ;;  %v1561_v39 = vmax.f32 %v1525_v32, 0.0  ;;  %v3098_v60 = vld [vmem:[#allocation10 + $0x30] sm:$0xff]  }
 0x335   : > { %v1531_v38 = vadd.f32 %v1530_v37, %v3842_v61  ;;  %v1562_v41 = vmax.f32 %v1527_v34, 0.0  ;;  %2699 = vmatprep.subr.bf16.mxu0 %v3098_v60  ;;  %v3099_v61 = vld [vmem:[#allocation10 + $0x38] sm:$0xff]  }
 0x336   : > { %v1563_v40 = vmax.f32 %v1529_v36, 0.0  ;;  %2700 = vmatpush3.bf16.msra.mxu0 %v3098_v60 }
 0x337   : > { %v1564_v42 = vmax.f32 %v1531_v38, 0.0  ;;  %2701 = vmatprep.subr.bf16.mxu0 %v3099_v61 }
 0x338   : > { %v1579_v45 = vpack.c.bf16 %v1563_v40, %v1561_v39 }
 0x339   : > { %v1580_v49 = vpack.c.bf16 %v1564_v42, %v1562_v41 }
 0x33a   : > { %2702 = vmatpush3.bf16.msra.mxu0 %v3099_v61 }
 0x33b   : > { %1804 = vmatprep.mubr.bf16.mxu1 %v1580_v49 }
 0x33c   : > { %1805 = vmatmul.mubr.bf16.gmra.mrb[60].mxu1 %v1579_v45 }
 0x3d7   : > { %v2607_v59 = vpop.f32.mrb[32].mxu1 }
 0x3d8   : > { %v2608_v48 = vpop.f32.mrb[33].mxu1 }
 0x3d9   : > { %v2609_v62 = vadd.f32 %v2608_v48, %v2607_v59  ;;  %v2610_v63 = vpop.f32.mrb[34].mxu1 }
 0x3da   : > { %v2611_v0 = vpop.f32.mrb[35].mxu1 }
 0x3db   : > { %v1751_v1 = vadd.f32 %v2609_v62, %v3879_v47  ;;  %v2612_v2 = vadd.f32 %v2611_v0, %v2610_v63 }
 0x3dd   : > { %v1754_v3 = vadd.f32 %v2612_v2, %v3879_v47  ;;  %v1813_v4 = vmax.f32 %v1751_v1, 0.0 }
 0x3df   : > { %v1814_v5 = vmax.f32 %v1754_v3, 0.0  ;;  %v2613_v6 = vpop.f32.mrb[36].mxu1 }
 0x3e0   : > { %v2614_v7 = vpop.f32.mrb[37].mxu1 }
 0x3e1   : > { %v2615_v44 = vadd.f32 %v2614_v7, %v2613_v6  ;;  %v2616_v8 = vpop.f32.mrb[38].mxu1  ;;  %v1829_v9 = vpack.c.bf16 %v1814_v5, %v1813_v4 }
 0x3e2   : > { %v2617_v43 = vpop.f32.mrb[39].mxu1 }
 0x3e3   : > { %v1759_v46 = vadd.f32 %v2615_v44, %v3879_v47  ;;  %v2618_v10 = vadd.f32 %v2617_v43, %v2616_v8  ;;  %2703 = vmatprep.mubr.bf16.mxu0 %v1829_v9 }
 0x3e5   : > { %v1762_v11 = vadd.f32 %v2618_v10, %v3879_v47  ;;  %v1815_v12 = vmax.f32 %v1759_v46, 0.0 }
 0x3e7   : > { %v1816_v13 = vmax.f32 %v1762_v11, 0.0  ;;  %v2619_v14 = vpop.f32.mrb[40].mxu1 }
 0x3e8   : > { %v2620_v15 = vpop.f32.mrb[41].mxu1 }
 0x3e9   : > { %v1830_v16 = vpack.c.bf16 %v1816_v13, %v1815_v12  ;;  %v2621_v17 = vadd.f32 %v2620_v15, %v2619_v14  ;;  %v2622_v18 = vpop.f32.mrb[42].mxu1 }
 0x3ea   : > { %v2623_v19 = vpop.f32.mrb[43].mxu1 }
 0x3eb   : > { %v1767_v20 = vadd.f32 %v2621_v17, %v3879_v47  ;;  %v2624_v21 = vadd.f32 %v2623_v19, %v2622_v18  ;;  %2704 = vmatmul.mubr.bf16.vlgmr.msra.gmra.mrb[32].mxu0 %v1830_v16  ;;  %v3106_v18 = vld [vmem:[#allocation11 + $0x30] sm:$0xff]   ;;  %v3107_v19 = vld [vmem:[#allocation11 + $0x38] sm:$0xff]  }
 0x3ec   : > { %2731 = vmatprep.subr.bf16.mxu1 %v3106_v18 }
 0x3ed   : > { %v1770_v22 = vadd.f32 %v2624_v21, %v3879_v47  ;;  %v1817_v23 = vmax.f32 %v1767_v20, 0.0  ;;  %2732 = vmatpush3.bf16.msra.mxu1 %v3106_v18  ;;  %v2567_v20 = vld [vmem:[%s4037_s3] ss:$0 sm:$0xff]  ;;  %s3346_s3 = sshll.u32 %s3435_s15, 4  ;;  %s3347_s3 = int_to_ptr.vmem [resolvable:$false] %s3346_s3 }
 0x3ee   : > { %2733 = vmatprep.subr.bf16.mxu1 %v3107_v19  ;;  %s3348_s1 = scalar_lea.vmem %s3347_s3, 4096  ;;  %p3349_p11 = scmp.lt.s32.totalorder %s3944_s13, %s3347_s3 }
 0x3ef   : > { %v1818_v24 = vmax.f32 %v1770_v22, 0.0  ;;  %v2625_v25 = vpop.f32.mrb[44].mxu1  ;;  %p3350_p12 = scmp.lt.s32.totalorder %s3348_s1, %s3342_s14 }
 0x3f0   : > { %v2626_v26 = vpop.f32.mrb[45].mxu1 }
 0x3f1   : > { %v2627_v27 = vadd.f32 %v2626_v26, %v2625_v25  ;;  %v2628_v28 = vpop.f32.mrb[46].mxu1  ;;  %v1831_v29 = vpack.c.bf16 %v1818_v24, %v1817_v23  ;;  %2734 = vmatpush3.bf16.msra.mxu1 %v3107_v19  ;;  %p3351_p13 = por %p3350_p12, %p3349_p11 }
 0x3f2   : > { %v2629_v30 = vpop.f32.mrb[47].mxu1 }
 0x3f3   : > { %v1775_v31 = vadd.f32 %v2627_v27, %v3879_v47  ;;  %v2630_v32 = vadd.f32 %v2629_v30, %v2628_v28  ;;  %2707 = vmatprep.mubr.bf16.mxu0 %v1831_v29  ;;  %p3352_p8 = pnand %p3351_p13, %p3345_p1 }
 0x3f5   : > { %v1778_v33 = vadd.f32 %v2630_v32, %v3879_v47  ;;  %v1819_v34 = vmax.f32 %v1775_v31, 0.0 }
 0x3f7   : > { %v1820_v35 = vmax.f32 %v1778_v33, 0.0  ;;  %v2631_v36 = vpop.f32.mrb[48].mxu1 }
 0x3f8   : > { %v2632_v37 = vpop.f32.mrb[49].mxu1 }
 0x3f9   : > { %v2633_v38 = vadd.f32 %v2632_v37, %v2631_v36  ;;  %v2634_v39 = vpop.f32.mrb[50].mxu1  ;;  %v1832_v40 = vpack.c.bf16 %v1820_v35, %v1819_v34 }
 0x3fa   : > { %v2635_v41 = vpop.f32.mrb[51].mxu1 }
 0x3fb   : > { %v1783_v42 = vadd.f32 %v2633_v38, %v3879_v47  ;;  %v2636_v45 = vadd.f32 %v2635_v41, %v2634_v39  ;;  %2708 = vmatmul.mubr.bf16.gmra.mrb[36].mxu0 %v1832_v40 }
 0x3fd   : > { %v1786_v49 = vadd.f32 %v2636_v45, %v3879_v47  ;;  %v1821_v50 = vmax.f32 %v1783_v42, 0.0 }
 0x3ff   : > { %v1822_v51 = vmax.f32 %v1786_v49, 0.0  ;;  %v2637_v52 = vpop.f32.mrb[52].mxu1 }
 0x400   : > { %v2638_v60 = vpop.f32.mrb[53].mxu1 }
 0x401   : > { %v2639_v61 = vadd.f32 %v2638_v60, %v2637_v52  ;;  %v2640_v53 = vpop.f32.mrb[54].mxu1  ;;  %v1833_v54 = vpack.c.bf16 %v1822_v51, %v1821_v50 }
 0x402   : > { %v2641_v55 = vpop.f32.mrb[55].mxu1 }
 0x403   : > { %v1791_v56 = vadd.f32 %v2639_v61, %v3879_v47  ;;  %v2642_v57 = vadd.f32 %v2641_v55, %v2640_v53  ;;  %2711 = vmatprep.mubr.bf16.mxu0 %v1833_v54 }
 0x405   : > { %v1794_v58 = vadd.f32 %v2642_v57, %v3879_v47  ;;  %v1823_v59 = vmax.f32 %v1791_v56, 0.0 }
 0x407   : > { %v1824_v48 = vmax.f32 %v1794_v58, 0.0  ;;  %v2643_v62 = vpop.f32.mrb[56].mxu1 }
 0x408   : > { %v2644_v63 = vpop.f32.mrb[57].mxu1 }
 0x409   : > { %v2645_v0 = vadd.f32 %v2644_v63, %v2643_v62  ;;  %v2646_v1 = vpop.f32.mrb[58].mxu1  ;;  %v1834_v2 = vpack.c.bf16 %v1824_v48, %v1823_v59 }
 0x40a   : > { %v2647_v3 = vpop.f32.mrb[59].mxu1 }
 0x40b   : > { %v1799_v4 = vadd.f32 %v2645_v0, %v3879_v47  ;;  %v2648_v5 = vadd.f32 %v2647_v3, %v2646_v1  ;;  %2712 = vmatmul.mubr.bf16.gmra.mrb[40].mxu0 %v1834_v2 }
 0x40d   : > { %v1802_v6 = vadd.f32 %v2648_v5, %v3879_v47  ;;  %v1825_v7 = vmax.f32 %v1799_v4, 0.0 }
 0x40f   : > { %v1826_v44 = vmax.f32 %v1802_v6, 0.0  ;;  %v2649_v8 = vpop.f32.mrb[60].mxu1 }
 0x410   : > { %v2650_v9 = vpop.f32.mrb[61].mxu1 }
 0x411   : > { %v2651_v43 = vadd.f32 %v2650_v9, %v2649_v8  ;;  %v2652_v46 = vpop.f32.mrb[62].mxu1  ;;  %v1835_v10 = vpack.c.bf16 %v1826_v44, %v1825_v7 }
 0x412   : > { %v2653_v11 = vpop.f32.mrb[63].mxu1 }
 0x413   : > { %v1807_v12 = vadd.f32 %v2651_v43, %v3879_v47  ;;  %v2654_v13 = vadd.f32 %v2653_v11, %v2652_v46  ;;  %2715 = vmatprep.mubr.bf16.mxu0 %v1835_v10 }
 0x415   : > { %v1810_v14 = vadd.f32 %v2654_v13, %v3879_v47  ;;  %v1827_v15 = vmax.f32 %v1807_v12, 0.0  ;;  %v3903_v13 = vld [vmem:[%s4038_s22] ss:$0 sm:$0xff] }
 0x417   : > { %v1828_v16 = vmax.f32 %v1810_v14, 0.0 }
 0x419   : > { %v1836_v17 = vpack.c.bf16 %v1828_v16, %v1827_v15 }
 0x41b   : > { %2716 = vmatmul.mubr.bf16.gmra.mrb[44].mxu0 %v1836_v17 }
 0x4be   : > { %v2705_v21 = vpop.f32.mrb[32].mxu0 }
 0x4bf   : > { %v1951_v22 = vadd.f32 %v2705_v21, %v2567_v20  ;;  %v1942_v23 = vpop.f32.mrb[33].mxu0 }
 0x4c0   : > { %v1943_v24 = vadd.f32 %v2567_v20, %v1942_v23  ;;  %v2706_v25 = vpop.f32.mrb[34].mxu0 }
 0x4c1   : > { %v1954_v47 = vadd.f32 %v2706_v25, %v2567_v20  ;;  %v1945_v26 = vpop.f32.mrb[35].mxu0  ;;  %v2007_v28 = vmax.f32 %v1951_v22, 0.0 }
 0x4c2   : > { %v1946_v27 = vadd.f32 %v2567_v20, %v1945_v26  ;;  %v2005_v30 = vmax.f32 %v1943_v24, 0.0 }
 0x4c3   : > { %v2008_v29 = vmax.f32 %v1954_v47, 0.0 }
 0x4c4   : > { %v2006_v31 = vmax.f32 %v1946_v27, 0.0 }
 0x4c5   : > { %v2022_v32 = vpack.c.bf16 %v2008_v29, %v2007_v28 }
 0x4c6   : > { %v2021_v33 = vpack.c.bf16 %v2006_v31, %v2005_v30 }
 0x4c8   : > { %2735 = vmatprep.mubr.bf16.mxu1 %v2021_v33 }
 0x4c9   : > { %2736 = vmatmul.mubr.bf16.vlgmr.msra.gmra.mrb[64].mxu1 %v2022_v32 }
 0x4ce   : > { %v2709_v34 = vpop.f32.mrb[36].mxu0 }
 0x4cf   : > { %v1967_v35 = vadd.f32 %v2709_v34, %v2567_v20  ;;  %v1958_v36 = vpop.f32.mrb[37].mxu0 }
 0x4d0   : > { %v1959_v37 = vadd.f32 %v2567_v20, %v1958_v36  ;;  %v2710_v38 = vpop.f32.mrb[38].mxu0 }
 0x4d1   : > { %v1970_v39 = vadd.f32 %v2710_v38, %v2567_v20  ;;  %v1961_v40 = vpop.f32.mrb[39].mxu0  ;;  %v2011_v42 = vmax.f32 %v1967_v35, 0.0 }
 0x4d2   : > { %v1962_v41 = vadd.f32 %v2567_v20, %v1961_v40  ;;  %v2009_v49 = vmax.f32 %v1959_v37, 0.0 }
 0x4d3   : > { %v2012_v45 = vmax.f32 %v1970_v39, 0.0 }
 0x4d4   : > { %v2010_v50 = vmax.f32 %v1962_v41, 0.0 }
 0x4d5   : > { %v2024_v51 = vpack.c.bf16 %v2012_v45, %v2011_v42 }
 0x4d6   : > { %v2023_v52 = vpack.c.bf16 %v2010_v50, %v2009_v49 }
 0x4d8   : > { %2739 = vmatprep.mubr.bf16.mxu1 %v2023_v52 }
 0x4d9   : > { %2740 = vmatmul.mubr.bf16.gmra.mrb[68].mxu1 %v2024_v51 }
 0x4de   : > { %v2713_v60 = vpop.f32.mrb[40].mxu0 }
 0x4df   : > { %v1983_v61 = vadd.f32 %v2713_v60, %v2567_v20  ;;  %v1974_v53 = vpop.f32.mrb[41].mxu0 }
 0x4e0   : > { %v1975_v54 = vadd.f32 %v2567_v20, %v1974_v53  ;;  %v2714_v55 = vpop.f32.mrb[42].mxu0 }
 0x4e1   : > { %v1986_v56 = vadd.f32 %v2714_v55, %v2567_v20  ;;  %v1977_v57 = vpop.f32.mrb[43].mxu0  ;;  %v2015_v59 = vmax.f32 %v1983_v61, 0.0 }
 0x4e2   : > { %v1978_v58 = vadd.f32 %v2567_v20, %v1977_v57  ;;  %v2013_v62 = vmax.f32 %v1975_v54, 0.0 }
 0x4e3   : > { %v2016_v48 = vmax.f32 %v1986_v56, 0.0 }
 0x4e4   : > { %v2014_v63 = vmax.f32 %v1978_v58, 0.0 }
 0x4e5   : > { %v2026_v0 = vpack.c.bf16 %v2016_v48, %v2015_v59 }
 0x4e6   : > { %v2025_v1 = vpack.c.bf16 %v2014_v63, %v2013_v62 }
 0x4e8   : > { %2743 = vmatprep.mubr.bf16.mxu1 %v2025_v1 }
 0x4e9   : > { %2744 = vmatmul.mubr.bf16.gmra.mrb[72].mxu1 %v2026_v0 }
 0x4ee   : > { %v2717_v2 = vpop.f32.mrb[44].mxu0 }
 0x4ef   : > { %v1999_v3 = vadd.f32 %v2717_v2, %v2567_v20  ;;  %v1990_v4 = vpop.f32.mrb[45].mxu0 }
 0x4f0   : > { %v1991_v5 = vadd.f32 %v2567_v20, %v1990_v4  ;;  %v2718_v6 = vpop.f32.mrb[46].mxu0 }
 0x4f1   : > { %v2002_v7 = vadd.f32 %v2718_v6, %v2567_v20  ;;  %v1993_v44 = vpop.f32.mrb[47].mxu0  ;;  %v2019_v9 = vmax.f32 %v1999_v3, 0.0 }
 0x4f2   : > { %v1994_v8 = vadd.f32 %v2567_v20, %v1993_v44  ;;  %v2017_v46 = vmax.f32 %v1991_v5, 0.0 }
 0x4f3   : > { %v2020_v43 = vmax.f32 %v2002_v7, 0.0 }
 0x4f4   : > { %v2018_v10 = vmax.f32 %v1994_v8, 0.0 }
 0x4f5   : > { %v2028_v11 = vpack.c.bf16 %v2020_v43, %v2019_v9 }
 0x4f6   : > { %v2027_v12 = vpack.c.bf16 %v2018_v10, %v2017_v46 }
 0x4f8   : > { %2747 = vmatprep.mubr.bf16.mxu1 %v2027_v12 }
 0x4f9   : > { %2748 = vmatmul.mubr.bf16.gmra.mrb[76].mxu1 %v2028_v11 }
 0x59c   : > { %v2737_v14 = vpop.f32.mrb[64].mxu1 }
 0x59d   : > { %v2143_v15 = vadd.f32 %v2737_v14, %v3903_v13  ;;  %v2134_v16 = vpop.f32.mrb[65].mxu1 }
 0x59e   : > { %v2135_v17 = vadd.f32 %v3903_v13, %v2134_v16  ;;  %v2738_v18 = vpop.f32.mrb[66].mxu1 }
 0x59f   : > { %v2199_v19 = vsub.f32 0.0, %v2143_v15  ;;  %v2146_v20 = vadd.f32 %v2738_v18, %v3903_v13  ;;  %v2137_v21 = vpop.f32.mrb[67].mxu1 }
 0x5a0   : > { %v2197_v22 = vsub.f32 0.0, %v2135_v17  ;;  %v2138_v23 = vadd.f32 %v3903_v13, %v2137_v21 }
 0x5a1   : > { %v2217_v24 = vmul.f32 1.442695, %v2199_v19  ;;  %v2200_v25 = vsub.f32 0.0, %v2146_v20 }
 0x5a2   : > { %v2213_v47 = vmul.f32 1.442695, %v2197_v22  ;;  %v2198_v26 = vsub.f32 0.0, %v2138_v23 }
 0x5a3   : > { %3108 = vpow2.f32 %v2217_v24  ;;  %v2219_v27 = vmul.f32 1.442695, %v2200_v25 }
 0x5a4   : > { %3110 = vpow2.f32 %v2213_v47  ;;  %v2215_v28 = vmul.f32 1.442695, %v2198_v26 }
 0x5a5   : > { %3112 = vpow2.f32 %v2219_v27 }
 0x5a6   : > { %3114 = vpow2.f32 %v2215_v28 }
 0x5ac   : > { %v2741_v29 = vpop.f32.mrb[68].mxu1 }
 0x5ad   : > { %v3109_v30 = vpop.eup %3108  ;;  %v2159_v31 = vadd.f32 %v2741_v29, %v3903_v13  ;;  %v2150_v32 = vpop.f32.mrb[69].mxu1 }
 0x5ae   : > { %v3111_v33 = vpop.eup %3110  ;;  %v2247_v34 = vadd.f32 1.0, %v3109_v30  ;;  %v2151_v35 = vadd.f32 %v3903_v13, %v2150_v32  ;;  %v2742_v36 = vpop.f32.mrb[70].mxu1 }
 0x5af   : > { %v3113_v37 = vpop.eup %3112  ;;  %v2245_v38 = vadd.f32 1.0, %v3111_v33  ;;  %v2203_v39 = vsub.f32 0.0, %v2159_v31  ;;  %v2162_v40 = vadd.f32 %v2742_v36, %v3903_v13  ;;  %v2153_v41 = vpop.f32.mrb[71].mxu1 }
 0x5b0   : > { %v3115_v42 = vpop.eup %3114  ;;  %3116 = vrcp.f32 %v2247_v34  ;;  %v2248_v45 = vadd.f32 1.0, %v3113_v37  ;;  %v2201_v49 = vsub.f32 0.0, %v2151_v35  ;;  %v2154_v50 = vadd.f32 %v3903_v13, %v2153_v41 }
 0x5b1   : > { %3118 = vrcp.f32 %v2245_v38  ;;  %v2246_v51 = vadd.f32 1.0, %v3115_v42  ;;  %v2225_v52 = vmul.f32 1.442695, %v2203_v39  ;;  %v2204_v60 = vsub.f32 0.0, %v2162_v40 }
 0x5b2   : > { %3120 = vrcp.f32 %v2248_v45  ;;  %v2221_v61 = vmul.f32 1.442695, %v2201_v49  ;;  %v2202_v53 = vsub.f32 0.0, %v2154_v50 }
 0x5b3   : > { %3122 = vrcp.f32 %v2246_v51  ;;  %v2227_v54 = vmul.f32 1.442695, %v2204_v60 }
 0x5b4   : > { %3124 = vpow2.f32 %v2225_v52  ;;  %v2223_v55 = vmul.f32 1.442695, %v2202_v53 }
 0x5b5   : > { %3126 = vpow2.f32 %v2221_v61 }
 0x5b6   : > { %3128 = vpow2.f32 %v2227_v54 }
 0x5b7   : > { %3130 = vpow2.f32 %v2223_v55 }
 0x5ba   : > { %v3117_v56 = vpop.eup %3116 }
 0x5bb   : > { %v3119_v57 = vpop.eup %3118  ;;  %2279 = vst [vmem:[%s3914_s12 + $0x10] sm:$0xff] %v3117_v56 }
 0x5bc   : > { %v3121_v58 = vpop.eup %3120  ;;  %2277 = vst [vmem:[%s3914_s12] sm:$0xff] %v3119_v57  ;;  %v2745_v59 = vpop.f32.mrb[72].mxu1 }
 0x5bd   : > { %v3123_v48 = vpop.eup %3122  ;;  %2280 = vst [vmem:[%s3914_s12 + $0x18] sm:$0xff] %v3121_v58  ;;  %v2175_v62 = vadd.f32 %v2745_v59, %v3903_v13  ;;  %v2166_v63 = vpop.f32.mrb[73].mxu1 }
 0x5be   : > { %v3125_v0 = vpop.eup %3124  ;;  %2278 = vst [vmem:[%s3914_s12 + $0x8] sm:$0xff] %v3123_v48  ;;  %v2167_v1 = vadd.f32 %v3903_v13, %v2166_v63  ;;  %v2746_v2 = vpop.f32.mrb[74].mxu1 }
 0x5bf   : > { %v3127_v3 = vpop.eup %3126  ;;  %v2251_v4 = vadd.f32 1.0, %v3125_v0  ;;  %v2207_v5 = vsub.f32 0.0, %v2175_v62  ;;  %v2178_v6 = vadd.f32 %v2746_v2, %v3903_v13  ;;  %v2169_v7 = vpop.f32.mrb[75].mxu1 }
 0x5c0   : > { %v3129_v44 = vpop.eup %3128  ;;  %v2249_v8 = vadd.f32 1.0, %v3127_v3  ;;  %v2205_v9 = vsub.f32 0.0, %v2167_v1  ;;  %v2170_v43 = vadd.f32 %v3903_v13, %v2169_v7 }
 0x5c1   : > { %v3131_v46 = vpop.eup %3130  ;;  %3132 = vrcp.f32 %v2251_v4  ;;  %v2252_v10 = vadd.f32 1.0, %v3129_v44  ;;  %v2233_v11 = vmul.f32 1.442695, %v2207_v5  ;;  %v2208_v12 = vsub.f32 0.0, %v2178_v6 }
 0x5c2   : > { %3134 = vrcp.f32 %v2249_v8  ;;  %v2250_v14 = vadd.f32 1.0, %v3131_v46  ;;  %v2229_v15 = vmul.f32 1.442695, %v2205_v9  ;;  %v2206_v16 = vsub.f32 0.0, %v2170_v43 }
 0x5c3   : > { %3136 = vrcp.f32 %v2252_v10  ;;  %v2235_v17 = vmul.f32 1.442695, %v2208_v12 }
 0x5c4   : > { %3138 = vrcp.f32 %v2250_v14  ;;  %v2231_v18 = vmul.f32 1.442695, %v2206_v16 }
 0x5c5   : > { %3140 = vpow2.f32 %v2233_v11 }
 0x5c6   : > { %3142 = vpow2.f32 %v2229_v15 }
 0x5c7   : > { %3144 = vpow2.f32 %v2235_v17 }
 0x5c8   : > { %3146 = vpow2.f32 %v2231_v18 }
 0x5cb   : > { %v3133_v19 = vpop.eup %3132 }
 0x5cc   : > { %v3135_v20 = vpop.eup %3134  ;;  %2283 = vst [vmem:[%s3914_s12 + $0x30] sm:$0xff] %v3133_v19  ;;  %v2749_v21 = vpop.f32.mrb[76].mxu1 }
 0x5cd   : > { %v3137_v22 = vpop.eup %3136  ;;  %2281 = vst [vmem:[%s3914_s12 + $0x20] sm:$0xff] %v3135_v20  ;;  %v2191_v23 = vadd.f32 %v2749_v21, %v3903_v13  ;;  %v2182_v24 = vpop.f32.mrb[77].mxu1 }
 0x5ce   : > { %v3139_v25 = vpop.eup %3138  ;;  %2284 = vst [vmem:[%s3914_s12 + $0x38] sm:$0xff] %v3137_v22  ;;  %v2183_v47 = vadd.f32 %v3903_v13, %v2182_v24  ;;  %v2750_v26 = vpop.f32.mrb[78].mxu1 }
 0x5cf   : > { %v3141_v27 = vpop.eup %3140  ;;  %2282 = vst [vmem:[%s3914_s12 + $0x28] sm:$0xff] %v3139_v25  ;;  %v2211_v28 = vsub.f32 0.0, %v2191_v23  ;;  %v2194_v29 = vadd.f32 %v2750_v26, %v3903_v13  ;;  %v2185_v30 = vpop.f32.mrb[79].mxu1 }
 0x5d0   : > { %v3143_v31 = vpop.eup %3142  ;;  %v2255_v32 = vadd.f32 1.0, %v3141_v27  ;;  %v2209_v33 = vsub.f32 0.0, %v2183_v47  ;;  %v2186_v34 = vadd.f32 %v3903_v13, %v2185_v30 }
 0x5d1   : > { %v3145_v35 = vpop.eup %3144  ;;  %v2253_v36 = vadd.f32 1.0, %v3143_v31  ;;  %v2212_v37 = vsub.f32 0.0, %v2194_v29  ;;  %v2241_v40 = vmul.f32 1.442695, %v2211_v28 }
 0x5d2   : > { %v3147_v38 = vpop.eup %3146  ;;  %3148 = vrcp.f32 %v2255_v32  ;;  %v2256_v39 = vadd.f32 1.0, %v3145_v35  ;;  %v2210_v41 = vsub.f32 0.0, %v2186_v34  ;;  %v2237_v45 = vmul.f32 1.442695, %v2209_v33 }
 0x5d3   : > { %3150 = vrcp.f32 %v2253_v36  ;;  %v2254_v42 = vadd.f32 1.0, %v3147_v38  ;;  %v2243_v49 = vmul.f32 1.442695, %v2212_v37 }
 0x5d4   : > { %3152 = vrcp.f32 %v2256_v39  ;;  %v2239_v50 = vmul.f32 1.442695, %v2210_v41 }
 0x5d5   : > { %3154 = vrcp.f32 %v2254_v42 }
 0x5d6   : > { %3156 = vpow2.f32 %v2241_v40 }
 0x5d7   : > { %3158 = vpow2.f32 %v2237_v45 }
 0x5d8   : > { %3160 = vpow2.f32 %v2243_v49 }
 0x5d9   : > { %3162 = vpow2.f32 %v2239_v50 }
 0x5dc   : > { %v3149_v13 = vpop.eup %3148 }
 0x5dd   : > { %v3151_v51 = vpop.eup %3150  ;;  %2287 = vst [vmem:[%s3914_s12 + $0x50] sm:$0xff] %v3149_v13 }
 0x5de   : > { %v3153_v52 = vpop.eup %3152  ;;  %2285 = vst [vmem:[%s3914_s12 + $0x40] sm:$0xff] %v3151_v51 }
 0x5df   : > { %v3155_v60 = vpop.eup %3154  ;;  %2288 = vst [vmem:[%s3914_s12 + $0x58] sm:$0xff] %v3153_v52 }
 0x5e0   : > { %v3157_v61 = vpop.eup %3156  ;;  %2286 = vst [vmem:[%s3914_s12 + $0x48] sm:$0xff] %v3155_v60 }
 0x5e1   : > { %v3159_v53 = vpop.eup %3158  ;;  %v2259_v54 = vadd.f32 1.0, %v3157_v61 }
 0x5e2   : > { %v3161_v55 = vpop.eup %3160  ;;  %v2257_v56 = vadd.f32 1.0, %v3159_v53 }
 0x5e3   : > { %v3163_v57 = vpop.eup %3162  ;;  %3164 = vrcp.f32 %v2259_v54  ;;  %v2260_v58 = vadd.f32 1.0, %v3161_v55 }
 0x5e4   : > { %3166 = vrcp.f32 %v2257_v56  ;;  %v2258_v59 = vadd.f32 1.0, %v3163_v57 }
 0x5e5   : > { %3168 = vrcp.f32 %v2260_v58 }
 0x5e6   : > { %3170 = vrcp.f32 %v2258_v59 }
 0x5ed   : > { %v3165_v48 = vpop.eup %3164 }
 0x5ee   : > { %v3167_v62 = vpop.eup %3166  ;;  %2291 = vst [vmem:[%s3914_s12 + $0x70] sm:$0xff] %v3165_v48 }
 0x5ef   : > { %v3169_v63 = vpop.eup %3168  ;;  %2289 = vst [vmem:[%s3914_s12 + $0x60] sm:$0xff] %v3167_v62 }
 0x5f0   : > { %v3171_v0 = vpop.eup %3170  ;;  %2292 = vst [vmem:[%s3914_s12 + $0x78] sm:$0xff] %v3169_v63 }
 0x5f1   : > { %2290 = vst [vmem:[%s3914_s12 + $0x68] sm:$0xff] %v3171_v0 }
 0x5f2   : > { %3355 = shalt.err (!%p3352_p8)
}
 0x5f3   : > { %s3356_s8 = scalar_lea.hbm %s3942_s27, 2048  ;;  %s3360_s12 = scalar_lea.hbm %s4039_s29, 4096 }
 0x5f4   : > { %p3357_p6 = scmp.ne.s32.totalorder %s3942_s27, %s3356_s8  ;;  %p3361_p3 = scmp.lt.u32.totalorder %s3942_s27, %s4039_s29 }
 0x5f5   : > { %p3362_p0 = scmp.lt.u32.totalorder %s3360_s12, %s3356_s8  ;;  %p3364_p2 = scmp.lt.u32.totalorder %s3356_s8, %s3942_s27 }
 0x5f6   : > { %p3358_p9 = pnand %p3357_p6, %p4040_p7 }
 0x5f7   : > { %p3363_p5 = por %p3362_p0, %p3361_p3 }
 0x5f8   : > { %p3359_p4 = pneg %p3358_p9 }
 0x5f9   : > { %p3365_p10 = por %p3364_p2, %p3363_p5 }
 0x5fb   : > { %p3366_p1 = pnand %p3365_p10, %p3359_p4 }
 0x5fd   : > { %3369 = shalt.err (!%p3366_p1)
}
 0x5fe   : > { %s3436_s30 = smov 128   ;;  %s3437_s14 = smov 8  }
 0x5ff   : > { %2840 = dma.vmem_to_hbm [thread:$0]  (%p4040_p7), %s3944_s13, 2048, %s3942_s27, %s2294_s23, %s3436_s30, %s3436_s30, %s3437_s14  }
 0x600 PF: > { %s2322_s15 = sand.u32 1, %s3408_s17   ;;  %p4041_p11 = scmp.ne.s32.totalorder %s4028_s11, 0 }
 0x601   : > { %p4042_p12 = scmp.ge.s32.totalorder %s3420_s20, 2  ;;  %s2323_s3 = scalar_lea.sflag [#allocation4], %s2322_s15 }
 0x603   : > { %p2863_p13 = pnand %p4042_p12, %p4041_p11 }
 0x605   : > { %3403 = dma.done.wait (!%p2863_p13), %s2323_s3, 2048  }
 0x606   : > { %3405 = vsyncadd (!%p2863_p13), %s2323_s3, 4294965248  ;;  %p27_p8 = scmp.ge.s32.totalorder %s3667_s16, 4   ;;  %s4043_s17 = smov %s3412_s18 }
 0x607   : > { %s4044_s18 = smov %s3416_s19  ;;  %s4045_s19 = smov %s3679_s26 }
 0x608   : > { %s4046_s20 = smov %s3667_s16  ;;  %29 = sbr.rel (!%p27_p8) target bundleno = 14 (0xe), region = 129 }
 0x60f   :  { %2328 = vsyncpa [#allocation3], 1 }
 0x610   :  { %2330 = vsyncpa [#allocation3 + $0x1], 1 }
 0x611   :  { %2331 = vsyncpa [#allocation6], 1 }
 0x612   :  { %2332 = vsyncpa [#allocation9], 1 }
 0x613   :  { %2333 = vsyncpa [#allocation12], 1 }
 0x614   :  { %2334 = vsyncpa [#allocation4], 1 }
 0x615   :  { %2336 = vsyncpa [#allocation4 + $0x1], 1 }

</bundles_post_ra>
